<compile_context>
chip_gen: v5e
topology: v5e:2x2
jax: 0.10.0
libtpu: 0.0.40
codegen_flags: <defaults>
</compile_context>

<pallas_src>
import functools

import jax
import jax.numpy as jnp
from jax.experimental import pallas as pl
from jax.experimental.pallas import tpu as pltpu


def _round_up(x, m):
    return (x + m - 1) // m * m


def _mlp2_kernel(x_ref, w1_ref, b1_ref, w2_ref, b2_ref, o_ref, *, final_act):
    """Fused: act2( relu(x @ W1 + b1) @ W2 + b2 ), all in VMEM."""
    x = x_ref[...].astype(jnp.bfloat16)                               # bf16 MXU feed
    h = jnp.dot(x, w1_ref[...], preferred_element_type=jnp.float32)   # (TN, H) f32 acc
    h = jnp.maximum(h + b1_ref[...], 0.0)
    y = jnp.dot(h.astype(jnp.bfloat16), w2_ref[...],
                preferred_element_type=jnp.float32)                   # (TN, Dout)
    y = y + b2_ref[...]
    if final_act == "relu":
        o_ref[...] = jnp.maximum(y, 0.0).astype(o_ref.dtype)
    else:  # "sigmoid" — tanh form keeps the work on the otherwise-idle EUP slot
        o_ref[...] = (0.5 * jnp.tanh(0.5 * y) + 0.5).astype(o_ref.dtype)


def _pick_tile(n, tn):
    """Batch tile: multiple of 8 sublanes, >= 2 grid steps when possible
    (so the 'parallel' axis can shard across both TensorCores on v7x)."""
    tn = min(tn, _round_up(pl.cdiv(n, 2), 8))
    return max(tn, 8)


def _mlp2_pallas(x, w1, b1, w2, b2, *, final_act, tn=1024):
    """x:(N,Din) f32, w1:(Din,H) bf16, b1:(1,H) f32, w2:(H,Dout) bf16,
    b2:(1,Dout) f32 -> (N,Dout) f32."""
    N, Din = x.shape
    H = w1.shape[1]
    Dout = w2.shape[1]

    tn = _pick_tile(N, tn)
    grid = (pl.cdiv(N, tn),)   # partial last block handled by Pallas masking

    kernel = functools.partial(_mlp2_kernel, final_act=final_act)
    return pl.pallas_call(
        kernel,
        out_shape=jax.ShapeDtypeStruct((N, Dout), jnp.float32),
        grid_spec=pltpu.PrefetchScalarGridSpec(
            num_scalar_prefetch=0,
            grid=grid,
            in_specs=[
                pl.BlockSpec((tn, Din), lambda i: (i, 0)),   # batch-tiled input
                pl.BlockSpec((Din, H), lambda i: (0, 0)),    # resident bf16 weights
                pl.BlockSpec((1, H), lambda i: (0, 0)),
                pl.BlockSpec((H, Dout), lambda i: (0, 0)),
                pl.BlockSpec((1, Dout), lambda i: (0, 0)),
            ],
            out_specs=pl.BlockSpec((tn, Dout), lambda i: (i, 0)),
        ),
        compiler_params=pltpu.CompilerParams(
            dimension_semantics=("parallel",),
            vmem_limit_bytes=64 * 1024 * 1024),
    )(x, w1, b1, w2, b2)


def prepare_matmul_params(params, compute_dtype=jnp.bfloat16):
    """One-time prep: slice k=1 conv weights into matmul matrices, transpose
    where needed, cast to bf16, reshape biases. Hoisted out of the forward."""
    return {
        "enc_w1": params["conv1_w"][:, :, 0].T.astype(compute_dtype),      # (768,384)
        "enc_b1": params["conv1_b"].reshape(1, -1).astype(jnp.float32),
        "enc_w2": params["conv2_w"][:, :, 0].T.astype(compute_dtype),      # (384,256)
        "enc_b2": params["conv2_b"].reshape(1, -1).astype(jnp.float32),
        "dec_w1": params["t_conv1_w"][:, :, 0].astype(compute_dtype),      # (256,384)
        "dec_b1": params["t_conv1_b"].reshape(1, -1).astype(jnp.float32),
        "dec_w2": params["t_conv2_w"][:, :, 0].astype(compute_dtype),      # (384,768)
        "dec_b2": params["t_conv2_b"].reshape(1, -1).astype(jnp.float32),
    }


def conv_ae_am_forward(x, prep, mode=1, *, tn=1024):
    """Pallas forward matching ConvAeAM.forward(x, mode); `prep` comes from
    prepare_matmul_params (weights already sliced/transposed/cast)."""
    if mode == 1:
        return _mlp2_pallas(x, prep["enc_w1"], prep["enc_b1"],
                            prep["enc_w2"], prep["enc_b2"],
                            final_act="relu", tn=tn)
    if mode == 2:
        return _mlp2_pallas(x, prep["dec_w1"], prep["dec_b1"],
                            prep["dec_w2"], prep["dec_b2"],
                            final_act="sigmoid", tn=tn)
    return x


def conv_ae_am_ref(x, params, mode=1):
    """Pure-JAX reference (conv1d with k=1 on a length-1 sequence == matmul)."""
    hp = jax.lax.Precision.HIGHEST
    if mode == 1:
        h = jax.nn.relu(jnp.dot(x, params["conv1_w"][:, :, 0].T, precision=hp)
                        + params["conv1_b"])
        return jax.nn.relu(jnp.dot(h, params["conv2_w"][:, :, 0].T, precision=hp)
                           + params["conv2_b"])
    if mode == 2:
        h = jax.nn.relu(jnp.dot(x, params["t_conv1_w"][:, :, 0], precision=hp)
                        + params["t_conv1_b"])
        return jax.nn.sigmoid(jnp.dot(h, params["t_conv2_w"][:, :, 0], precision=hp)
                              + params["t_conv2_b"])
    return x


def init_params(key):
    """Deterministic PyTorch-layout parameters (default Conv1d-style init)."""
    ks = jax.random.split(key, 8)

    def conv_init(kw, kb, out_c, in_c):            # Conv1d weight: (out, in, 1)
        bound = 1.0 / jnp.sqrt(jnp.float32(in_c))
        w = jax.random.uniform(kw, (out_c, in_c, 1), jnp.float32, -bound, bound)
        b = jax.random.uniform(kb, (out_c,), jnp.float32, -bound, bound)
        return w, b

    def tconv_init(kw, kb, in_c, out_c):           # ConvTranspose1d: (in, out, 1)
        bound = 1.0 / jnp.sqrt(jnp.float32(in_c))
        w = jax.random.uniform(kw, (in_c, out_c, 1), jnp.float32, -bound, bound)
        b = jax.random.uniform(kb, (out_c,), jnp.float32, -bound, bound)
        return w, b

    p = {}
    p["conv1_w"], p["conv1_b"] = conv_init(ks[0], ks[1], 384, 768)
    p["conv2_w"], p["conv2_b"] = conv_init(ks[2], ks[3], 256, 384)
    p["t_conv1_w"], p["t_conv1_b"] = tconv_init(ks[4], ks[5], 256, 384)
    p["t_conv2_w"], p["t_conv2_b"] = tconv_init(ks[6], ks[7], 384, 768)
    return p


if __name__ == "__main__":
    B = 16  # with the >=2-step tile clamp this runs a 2-step (tn=8) grid
    key = jax.random.PRNGKey(0)
    k_param, k_x = jax.random.split(key)
    params = init_params(k_param)
    prep = prepare_matmul_params(params)            # one-time weight prep
    x = jax.random.normal(k_x, (B, 768), dtype=jnp.float32)

    # bf16 MXU operands vs a HIGHEST-precision f32 reference -> loosened tol.
    ATOL, RTOL = 2e-2, 2e-2

    # mode=1: encoder  (B, 768) -> (B, 256)
    z = conv_ae_am_forward(x, prep, mode=1)
    z = jax.block_until_ready(z)
    z_ref = conv_ae_am_ref(x, params, mode=1)
    assert z.shape == (B, 256)
    assert jnp.allclose(z, z_ref, atol=ATOL, rtol=RTOL), (
        f"mode=1 max abs err = {float(jnp.max(jnp.abs(z - z_ref)))}")

    # mode=2: decoder  (B, 256) -> (B, 768)
    y = conv_ae_am_forward(z, prep, mode=2)
    y = jax.block_until_ready(y)
    y_ref = conv_ae_am_ref(z, params, mode=2)
    assert y.shape == (B, 768)
    assert jnp.allclose(y, y_ref, atol=ATOL, rtol=RTOL), (
        f"mode=2 max abs err = {float(jnp.max(jnp.abs(y - y_ref)))}")

    print("KERNEL_OK")
</pallas_src>

<mosaic_0001>
module attributes {stable_mosaic.version = 11 : i64} {
  func.func @_mlp2_kernel(%arg0: i32, %arg1: memref<8x768xf32, #tpu.memory_space<vmem>>, %arg2: memref<768x384xbf16, #tpu.memory_space<vmem>>, %arg3: memref<1x384xf32, #tpu.memory_space<vmem>>, %arg4: memref<384x256xbf16, #tpu.memory_space<vmem>>, %arg5: memref<1x256xf32, #tpu.memory_space<vmem>>, %arg6: memref<8x256xf32, #tpu.memory_space<vmem>>) attributes {dimension_semantics = [#tpu.dimension_semantics<parallel>], iteration_bounds = array<i64: 2>, scalar_prefetch = 0 : i64, scratch_operands = 0 : i64, tpu.core_type = #tpu.core_type<tc>, window_params = [{transform_indices = @transform_0, window_bounds = array<i64: 8, 768>}, {pipeline_mode = #tpu.pipeline_mode<synchronous>, transform_indices = @transform_1, window_bounds = array<i64: 768, 384>}, {pipeline_mode = #tpu.pipeline_mode<synchronous>, transform_indices = @transform_2, window_bounds = array<i64: 1, 384>}, {pipeline_mode = #tpu.pipeline_mode<synchronous>, transform_indices = @transform_3, window_bounds = array<i64: 384, 256>}, {pipeline_mode = #tpu.pipeline_mode<synchronous>, transform_indices = @transform_4, window_bounds = array<i64: 1, 256>}, {transform_indices = @transform_5, window_bounds = array<i64: 8, 256>}]} {
    %c0 = arith.constant 0 : index
    %c0_0 = arith.constant 0 : index
    %0 = vector.load %arg1[%c0, %c0_0] : memref<8x768xf32, #tpu.memory_space<vmem>>, vector<8x768xf32>
    %1 = arith.truncf %0 : vector<8x768xf32> to vector<8x768xbf16>
    %c0_1 = arith.constant 0 : index
    %c0_2 = arith.constant 0 : index
    %2 = vector.load %arg2[%c0_1, %c0_2] : memref<768x384xbf16, #tpu.memory_space<vmem>>, vector<768x384xbf16>
    %cst = arith.constant dense<0.000000e+00> : vector<8x384xf32>
    %3 = tpu.matmul %1, %2, %cst {dimension_numbers = #tpu.dot_dimension_numbers<[1], [0], [0], [1], [0, 0, 1, 1], [], []>} : vector<8x768xbf16>, vector<768x384xbf16>, vector<8x384xf32> -> vector<8x384xf32>
    %c0_3 = arith.constant 0 : index
    %c0_4 = arith.constant 0 : index
    %4 = vector.load %arg3[%c0_3, %c0_4] : memref<1x384xf32, #tpu.memory_space<vmem>>, vector<1x384xf32>
    %5 = vector.broadcast %4 : vector<1x384xf32> to vector<8x384xf32>
    %6 = arith.addf %3, %5 : vector<8x384xf32>
    %cst_5 = arith.constant 0.000000e+00 : f32
    %7 = vector.broadcast %cst_5 : f32 to vector<8x384xf32>
    %8 = arith.maximumf %6, %7 : vector<8x384xf32>
    %9 = arith.truncf %8 : vector<8x384xf32> to vector<8x384xbf16>
    %c0_6 = arith.constant 0 : index
    %c0_7 = arith.constant 0 : index
    %10 = vector.load %arg4[%c0_6, %c0_7] : memref<384x256xbf16, #tpu.memory_space<vmem>>, vector<384x256xbf16>
    %cst_8 = arith.constant dense<0.000000e+00> : vector<8x256xf32>
    %11 = tpu.matmul %9, %10, %cst_8 {dimension_numbers = #tpu.dot_dimension_numbers<[1], [0], [0], [1], [0, 0, 1, 1], [], []>} : vector<8x384xbf16>, vector<384x256xbf16>, vector<8x256xf32> -> vector<8x256xf32>
    %c0_9 = arith.constant 0 : index
    %c0_10 = arith.constant 0 : index
    %12 = vector.load %arg5[%c0_9, %c0_10] : memref<1x256xf32, #tpu.memory_space<vmem>>, vector<1x256xf32>
    %13 = vector.broadcast %12 : vector<1x256xf32> to vector<8x256xf32>
    %14 = arith.addf %11, %13 : vector<8x256xf32>
    %cst_11 = arith.constant 0.000000e+00 : f32
    %15 = vector.broadcast %cst_11 : f32 to vector<8x256xf32>
    %16 = arith.maximumf %14, %15 : vector<8x256xf32>
    %c0_12 = arith.constant 0 : index
    %c0_13 = arith.constant 0 : index
    %17 = vector.load %arg6[%c0_12, %c0_13] : memref<8x256xf32, #tpu.memory_space<vmem>>, vector<8x256xf32>
    tpu.vector_store %arg6[%c0_12, %c0_13], %16 {strides = array<i32>} : memref<8x256xf32, #tpu.memory_space<vmem>>, vector<8x256xf32>,
    return
  }
  func.func @transform_0(%arg0: i32) -> (i32, i32) {
    %c0_i32 = arith.constant 0 : i32
    %c0_i32_0 = arith.constant 0 : i32
    return %arg0, %c0_i32 : i32, i32
  }
  func.func @transform_1(%arg0: i32) -> (i32, i32) {
    %c0_i32 = arith.constant 0 : i32
    %c0_i32_0 = arith.constant 0 : i32
    %c0_i32_1 = arith.constant 0 : i32
    return %c0_i32, %c0_i32_0 : i32, i32
  }
  func.func @transform_2(%arg0: i32) -> (i32, i32) {
    %c0_i32 = arith.constant 0 : i32
    %c0_i32_0 = arith.constant 0 : i32
    %c0_i32_1 = arith.constant 0 : i32
    return %c0_i32, %c0_i32_0 : i32, i32
  }
  func.func @transform_3(%arg0: i32) -> (i32, i32) {
    %c0_i32 = arith.constant 0 : i32
    %c0_i32_0 = arith.constant 0 : i32
    %c0_i32_1 = arith.constant 0 : i32
    return %c0_i32, %c0_i32_0 : i32, i32
  }
  func.func @transform_4(%arg0: i32) -> (i32, i32) {
    %c0_i32 = arith.constant 0 : i32
    %c0_i32_0 = arith.constant 0 : i32
    %c0_i32_1 = arith.constant 0 : i32
    return %c0_i32, %c0_i32_0 : i32, i32
  }
  func.func @transform_5(%arg0: i32) -> (i32, i32) {
    %c0_i32 = arith.constant 0 : i32
    %c0_i32_0 = arith.constant 0 : i32
    return %arg0, %c0_i32 : i32, i32
  }
}

</mosaic_0001>

<bundles_post_ra>
// kernel: tpu_custom_call.1
= control target key start
LH: loop header
LB: loop body
LE: loop exit
PB: predicated region body
PF: predicated region fallthrough
CT: control target
= control target key end

     0   :  { %s3501_s0 = inlined_call_operand.hbm [shape: f32[16,768], index: 0, kind: input, shape index: {}]   ;;  %s3502_s1 = inlined_call_operand.hbm [shape: bf16[768,384], index: 1, kind: input, shape index: {}]   ;;  %s3503_s2 = inlined_call_operand.hbm [shape: f32[1,384], index: 2, kind: input, shape index: {}]   ;;  %s3504_s3 = inlined_call_operand.hbm [shape: bf16[384,256], index: 3, kind: input, shape index: {}]   ;;  %s3505_s4 = inlined_call_operand.vmem [shape: f32[1,256], index: 4, kind: input, shape index: {}]   ;;  %s3506_s5 = inlined_call_operand.hbm [shape: f32[16,256], index: 5, kind: output, shape index: {}]  }
   0x1   :  { %3507 = sst [smem:[#allocation15_spill]] %s3502_s1 }
   0x2   :  { %3508 = sst [smem:[#allocation16_spill]] %s3503_s2 }
   0x3   :  { %10 = vsyncpa [#allocation3], 0 }
   0x4   :  { %12 = vsyncpa [#allocation3 + $0x1], 0 }
   0x5   :  { %13 = vsyncpa [#allocation6], 0 }
   0x6   :  { %14 = vsyncpa [#allocation9], 0 }
   0x7   :  { %15 = vsyncpa [#allocation4], 0 }
   0x8   :  { %17 = vsyncpa [#allocation4 + $0x1], 0  ;;  %s3298_s18 = smov 0   ;;  %s3300_s19 = smov 0  }
   0x9   :  { %s3302_s20 = smov 0   ;;  %s3304_s21 = smov 0  }
   0xa LB: > { %s3509_s1 = sld [smem:[#allocation15_spill]]  ;;  %s3322_s25 = sadd.s32 4294967295, %s3259_s21   ;;  %s3259_s21 = sphi %s3304_s21, %s3521_s21   ;;  %s3255_s20 = sphi %s3302_s20, %s3520_s20   ;;  %s3251_s19 = sphi %s3300_s19, %s3519_s19   ;;  %s3247_s18 = sphi %s3298_s18, %s3518_s18  }
   0xb   : > { %p2004_p0 = scmp.ge.s32.totalorder %s3259_s21, 1  ;;  %p44_p1 = scmp.eq.s32.totalorder %s3322_s25, 0 }
   0xc   : > { %p164_p2 = scmp.lt.s32.totalorder %s3259_s21, 3  ;;  %s3261_s27 = smov [#allocation5]  }
   0xd   : > { %s177_s28 = sshll.u32 %s3261_s27, 4  ;;  %s3511_s2 = sld [smem:[#allocation16_spill]]  ;;  %s178_s28 = int_to_ptr.vmem [resolvable:$true] %s177_s28 }
   0xe   : > { %p3327_p3 = pnand %p2004_p0, %p164_p2  ;;  %s201_s10 = sshll.u32 %s3504_s3, 4  ;;  %s202_s10 = int_to_ptr.hbm [resolvable:$true] %s201_s10 }
   0xf   : > { %s3262_s11 = smov [#allocation7]   ;;  %s3263_s13 = smov 192  }
  0x10   : > { %s175_s24 = sshll.u32 %s3509_s1, 4  ;;  %p3000_p4 = pneg %p3327_p3  ;;  %s176_s24 = int_to_ptr.hbm [resolvable:$true] %s175_s24 }
  0x11   : > { %s192_s12 = sshll.u32 %s3262_s11, 4  ;;  %s3264_s14 = smov 12   ;;  %s193_s12 = int_to_ptr.vmem [resolvable:$true] %s192_s12 }
  0x12   : > { %p3339_p6 = pnand %p3000_p4, %p44_p1  ;;  %s3265_s15 = smov [#allocation8]  }
  0x13   : > { %s190_s6 = sshll.u32 %s3511_s2, 4  ;;  %s203_s16 = sshll.u32 %s3265_s15, 4  ;;  %s191_s6 = int_to_ptr.hbm [resolvable:$true] %s190_s6  ;;  %s204_s16 = int_to_ptr.vmem [resolvable:$true] %s203_s16 }
  0x14   : > { %3003 = dma.hbm_to_vmem [thread:$0]  (!%p3339_p6), %s176_s24, 18432, %s178_s28, [#allocation6], %s3263_s13, %s3263_s13, %s3264_s14  }
  0x15   : > { %3006 = dma.hbm_to_vmem [thread:$0]  (!%p3339_p6), %s191_s6, 48, %s193_s12, [#allocation6]  }
  0x16   : > { %s3266_s17 = smov 128   ;;  %s3267_s22 = smov 8  }
  0x17   : > { %3009 = dma.hbm_to_vmem [thread:$0]  (!%p3339_p6), %s202_s10, 6144, %s204_s16, [#allocation9], %s3266_s17, %s3266_s17, %s3267_s22  }
  0x18   : > { %s2003_s23 = sadd.s32 4294967294, %s3259_s21   ;;  %s3354_s24 = sadd.s32 1, %s3259_s21  }
  0x19   : > { %s30_s27 = sadd.s32 1, %s3255_s20  ;;  %s27_s28 = ssub.s32 %s3259_s21, %s3354_s24 }
  0x1a   : > { %p37_p7 = scmp.ne.s32.totalorder %s3255_s20, %s3251_s19  ;;  %p28_p8 = scmp.eq.s32.totalorder %s27_s28, 0 }
  0x1b   : > { %p38_p9 = scmp.eq.s32.totalorder %s3259_s21, 0  ;;  %p43_p10 = scmp.ne.s32.totalorder %s3251_s19, %s3247_s18 }
  0x1c   : > { %p151_p11 = scmp.eq.s32.totalorder %s3322_s25, 1  ;;  %p157_p2 = scmp.eq.s32.totalorder %s2003_s23, 1 }
  0x1d   : > { %s3366_s29 = scalar_select %p28_p8, %s3255_s20, %s30_s27  }
  0x1e   : > { %p39_p12 = por %p38_p9, %p37_p7  ;;  %p3370_p13 = por %p44_p1, %p43_p10 }
  0x1f   : > { %p3374_p0 = por %p151_p11, %p37_p7  ;;  %p3021_p4 = scmp.lt.s32.totalorder %s3259_s21, 2 }
  0x20   : > { %s220_s7 = sand.u32 1, %s3255_s20   ;;  %p3380_p6 = por %p157_p2, %p43_p10 }
  0x21   : > { %s2981_s9 = smul.u32 48, %s220_s7  ;;  %p3384_p8 = pnand %p3021_p4, %p39_p12 }
  0x22   : > { %s2982_s11 = smul.u32 48, %s3259_s21  ;;  %s221_s22 = scalar_lea.sflag [#allocation3], %s220_s7 }
  0x23   : > { %s224_s15 = scalar_lea.vmem [#allocation2], %s2981_s9  ;;  %p3159_p9 = pneg %p3384_p8 }
  0x24   : > { %s229_s14 = scalar_lea.hbm %s3501_s0, %s2982_s11  ;;  %s233_s16 = sshll.u32 %s224_s15, 4  ;;  %s234_s16 = int_to_ptr.vmem [resolvable:$true] %s233_s16 }
  0x25   : > { %s231_s17 = sshll.u32 %s229_s14, 4  ;;  %s3162_s2 = scalar_lea.hbm %s3501_s0, 96  ;;  %s232_s17 = int_to_ptr.hbm [resolvable:$true] %s231_s17 }
  0x26   : > { %s3155_s23 = sshra.s32 %s232_s17, 4  ;;  %s3156_s23 = int_to_ptr.hbm [resolvable:$true] %s3155_s23 }
  0x27   : > { %s3157_s27 = scalar_lea.hbm %s3156_s23, 48  ;;  %p3163_p12 = scmp.lt.s32.totalorder %s3156_s23, %s3501_s0 }
  0x28   : > { %p3158_p7 = scmp.ne.s32.totalorder %s3156_s23, %s3157_s27  ;;  %p3164_p2 = scmp.lt.s32.totalorder %s3162_s2, %s3157_s27 }
  0x2a   : > { %p3160_p10 = pnand %p3159_p9, %p3158_p7  ;;  %p3165_p4 = por %p3164_p2, %p3163_p12 }
  0x2c   : > { %p3161_p11 = pneg %p3160_p10 }
  0x2e   : > { %p3166_p5 = pnand %p3165_p4, %p3161_p11 }
  0x30   : > { %3169 = shalt.err (!%p3166_p5)
}
  0x31   : > { %3013 = dma.hbm_to_vmem [thread:$0]  (!%p3384_p8), %s232_s17, 768, %s234_s16, %s221_s22  }
  0x32   : > { %242 = sbr.rel (%p3327_p3) target bundleno = 496 (0x1f0), region = 40  ;;  %s3405_s7 = sand.u32 (!%p3327_p3), 1, %s3251_s19  }
  0x33   : > { %s2983_s1 = smul.u32 (!%p3327_p3), 48, %s3405_s7  ;;  %s245_s9 = scalar_lea.sflag (!%p3327_p3), [#allocation3], %s3405_s7 }
  0x35   : > { %s3409_s13 = scalar_lea.vmem (!%p3327_p3), [#allocation2], %s2983_s1 }
  0x37   : > { %3230 = dma.done.wait (%p3370_p13), %s245_s9, 768  }
  0x38   : > { %3232 = vsyncadd (%p3370_p13), %s245_s9, 4294966528 }
  0x39   : > { %3234 = dma.done.wait (%p44_p1), [#allocation6], 18480  }
  0x3a   : > { %3236 = vsyncadd (%p44_p1), [#allocation6], 4294948816 }
  0x3b   : > { %3238 = dma.done.wait (%p44_p1), [#allocation9], 6144  }
  0x3c   : > { %3240 = vsyncadd (%p44_p1), [#allocation9], 4294961152  ;;  %v2101_v0 = vld [vmem:[#allocation5 + $0xa8] sm:$0xf]  ;;  %v2810_v1 = vld [vmem:[#allocation5 + $0xb0] sm:$0xf0] }
  0x3d   : > { %v2197_v2 = vld [vmem:[#allocation5 + $0x168] sm:$0xf]  ;;  %v2102_v3 = vor.u32 %v2810_v1, %v2101_v0  ;;  %v2834_v4 = vld [vmem:[#allocation5 + $0x170] sm:$0xf0]  ;;  %v2089_v11 = vld [vmem:[#allocation5 + $0x90] sm:$0xf] }
  0x3e   : > { %v2293_v5 = vld [vmem:[#allocation5 + $0x228] sm:$0xf]  ;;  %v2858_v6 = vld [vmem:[#allocation5 + $0x230] sm:$0xf0]  ;;  %v2198_v7 = vor.u32 %v2834_v4, %v2197_v2  ;;  %v2807_v13 = vld [vmem:[#allocation5 + $0x98] sm:$0xf0] }
  0x3f   : > { %v2294_v8 = vor.u32 %v2858_v6, %v2293_v5  ;;  %v2389_v9 = vld [vmem:[#allocation5 + $0x2e8] sm:$0xf]  ;;  %v2882_v10 = vld [vmem:[#allocation5 + $0x2f0] sm:$0xf0]  ;;  %1271 = vmatpush.bf16.msra.mxu0 %v2102_v3  ;;  %v2185_v14 = vld [vmem:[#allocation5 + $0x150] sm:$0xf]  ;;  %v2090_v16 = vor.u32 %v2807_v13, %v2089_v11 }
  0x40   : > { %v2390_v12 = vor.u32 %v2882_v10, %v2389_v9  ;;  %v2831_v15 = vld [vmem:[#allocation5 + $0x158] sm:$0xf0]  ;;  %1284 = vmatpush.bf16.msra.mxu1 %v2198_v7  ;;  %v2281_v18 = vld [vmem:[#allocation5 + $0x210] sm:$0xf]  ;;  %v2077_v23 = vld [vmem:[#allocation5 + $0x78] sm:$0xf] }
  0x41   : > { %1297 = vmatpush.bf16.msra.mxu2 %v2294_v8  ;;  %v2186_v17 = vor.u32 %v2831_v15, %v2185_v14  ;;  %v2855_v19 = vld [vmem:[#allocation5 + $0x218] sm:$0xf0]  ;;  %v2377_v20 = vld [vmem:[#allocation5 + $0x2d0] sm:$0xf]  ;;  %v2804_v24 = vld [vmem:[#allocation5 + $0x80] sm:$0xf0] }
  0x42   : > { %1310 = vmatpush.bf16.msra.mxu3 %v2390_v12  ;;  %v2282_v21 = vor.u32 %v2855_v19, %v2281_v18  ;;  %v2879_v22 = vld [vmem:[#allocation5 + $0x2d8] sm:$0xf0]  ;;  %v2173_v26 = vld [vmem:[#allocation5 + $0x138] sm:$0xf]  ;;  %v2828_v27 = vld [vmem:[#allocation5 + $0x140] sm:$0xf0]  ;;  %v2078_v29 = vor.u32 %v2804_v24, %v2077_v23 }
  0x43   : > { %v2378_v25 = vor.u32 %v2879_v22, %v2377_v20  ;;  %v2269_v28 = vld [vmem:[#allocation5 + $0x1f8] sm:$0xf]  ;;  %1272 = vmatpush.bf16.msra.mxu0 %v2090_v16  ;;  %v2852_v30 = vld [vmem:[#allocation5 + $0x200] sm:$0xf0]  ;;  %v2174_v33 = vor.u32 %v2828_v27, %v2173_v26  ;;  %v2065_v35 = vld [vmem:[#allocation5 + $0x60] sm:$0xf] }
  0x44   : > { %v2365_v31 = vld [vmem:[#allocation5 + $0x2b8] sm:$0xf]  ;;  %v2876_v32 = vld [vmem:[#allocation5 + $0x2c0] sm:$0xf0]  ;;  %1285 = vmatpush.bf16.msra.mxu1 %v2186_v17  ;;  %v2270_v34 = vor.u32 %v2852_v30, %v2269_v28  ;;  %v2801_v36 = vld [vmem:[#allocation5 + $0x68] sm:$0xf0] }
  0x45   : > { %1298 = vmatpush.bf16.msra.mxu2 %v2282_v21  ;;  %v2161_v37 = vld [vmem:[#allocation5 + $0x120] sm:$0xf]  ;;  %v2366_v38 = vor.u32 %v2876_v32, %v2365_v31  ;;  %v2825_v39 = vld [vmem:[#allocation5 + $0x128] sm:$0xf0]  ;;  %v2066_v44 = vor.u32 %v2801_v36, %v2065_v35  ;;  %v2053_v47 = vld [vmem:[#allocation5 + $0x48] sm:$0xf] }
  0x46   : > { %1311 = vmatpush.bf16.msra.mxu3 %v2378_v25  ;;  %v2257_v40 = vld [vmem:[#allocation5 + $0x1e0] sm:$0xf]  ;;  %v2849_v41 = vld [vmem:[#allocation5 + $0x1e8] sm:$0xf0]  ;;  %v2162_v45 = vor.u32 %v2825_v39, %v2161_v37  ;;  %v2798_v48 = vld [vmem:[#allocation5 + $0x50] sm:$0xf0] }
  0x47   : > { %v2353_v42 = vld [vmem:[#allocation5 + $0x2a0] sm:$0xf]  ;;  %v2873_v43 = vld [vmem:[#allocation5 + $0x2a8] sm:$0xf0]  ;;  %1273 = vmatpush.bf16.msra.mxu0 %v2078_v29  ;;  %v2258_v46 = vor.u32 %v2849_v41, %v2257_v40  ;;  %v2149_v49 = vld [vmem:[#allocation5 + $0x108] sm:$0xf]  ;;  %v2054_v56 = vor.u32 %v2798_v48, %v2053_v47 }
  0x48   : > { %1286 = vmatpush.bf16.msra.mxu1 %v2174_v33  ;;  %v2354_v50 = vor.u32 %v2873_v43, %v2353_v42  ;;  %v2822_v51 = vld [vmem:[#allocation5 + $0x110] sm:$0xf0]  ;;  %v2245_v52 = vld [vmem:[#allocation5 + $0x1c8] sm:$0xf]  ;;  %v2041_v59 = vld [vmem:[#allocation5 + $0x30] sm:$0xf] }
  0x49   : > { %1299 = vmatpush.bf16.msra.mxu2 %v2270_v34  ;;  %v2846_v53 = vld [vmem:[#allocation5 + $0x1d0] sm:$0xf0]  ;;  %v2341_v54 = vld [vmem:[#allocation5 + $0x288] sm:$0xf]  ;;  %v2150_v57 = vor.u32 %v2822_v51, %v2149_v49  ;;  %v2795_v60 = vld [vmem:[#allocation5 + $0x38] sm:$0xf0] }
  0x4a   : > { %1312 = vmatpush.bf16.msra.mxu3 %v2366_v38  ;;  %v2870_v55 = vld [vmem:[#allocation5 + $0x290] sm:$0xf0]  ;;  %v2246_v58 = vor.u32 %v2846_v53, %v2245_v52  ;;  %v2137_v61 = vld [vmem:[#allocation5 + $0xf0] sm:$0xf]  ;;  %v2819_v63 = vld [vmem:[#allocation5 + $0xf8] sm:$0xf0]  ;;  %v2042_v4 = vor.u32 %v2795_v60, %v2041_v59 }
  0x4b   : > { %1274 = vmatpush.bf16.msra.mxu0 %v2066_v44  ;;  %v2342_v62 = vor.u32 %v2870_v55, %v2341_v54  ;;  %v2233_v0 = vld [vmem:[#allocation5 + $0x1b0] sm:$0xf]  ;;  %v2843_v1 = vld [vmem:[#allocation5 + $0x1b8] sm:$0xf0]  ;;  %v2138_v5 = vor.u32 %v2819_v63, %v2137_v61  ;;  %v2029_v7 = vld [vmem:[#allocation5 + $0x18] sm:$0xf] }
  0x4c   : > { %1287 = vmatpush.bf16.msra.mxu1 %v2162_v45  ;;  %v2329_v2 = vld [vmem:[#allocation5 + $0x270] sm:$0xf]  ;;  %v2867_v3 = vld [vmem:[#allocation5 + $0x278] sm:$0xf0]  ;;  %v2234_v6 = vor.u32 %v2843_v1, %v2233_v0  ;;  %v2792_v8 = vld [vmem:[#allocation5 + $0x20] sm:$0xf0] }
  0x4d   : > { %1300 = vmatpush.bf16.msra.mxu2 %v2258_v46  ;;  %v2125_v9 = vld [vmem:[#allocation5 + $0xd8] sm:$0xf]  ;;  %v2330_v10 = vor.u32 %v2867_v3, %v2329_v2  ;;  %v2816_v11 = vld [vmem:[#allocation5 + $0xe0] sm:$0xf0]  ;;  %v2030_v16 = vor.u32 %v2792_v8, %v2029_v7  ;;  %v2017_v17 = vld [vmem:[#allocation5] sm:$0xf] }
  0x4e   : > { %1313 = vmatpush.bf16.msra.mxu3 %v2354_v50  ;;  %v2221_v12 = vld [vmem:[#allocation5 + $0x198] sm:$0xf]  ;;  %v2840_v13 = vld [vmem:[#allocation5 + $0x1a0] sm:$0xf0]  ;;  %v2789_v18 = vld [vmem:[#allocation5 + $0x8] sm:$0xf0]  ;;  %v2126_v19 = vor.u32 %v2816_v11, %v2125_v9 }
  0x4f   : > { %1275 = vmatpush.bf16.msra.mxu0 %v2054_v56  ;;  %v2317_v14 = vld [vmem:[#allocation5 + $0x258] sm:$0xf]  ;;  %v2864_v15 = vld [vmem:[#allocation5 + $0x260] sm:$0xf0]  ;;  %v2222_v20 = vor.u32 %v2840_v13, %v2221_v12  ;;  %v2113_v21 = vld [vmem:[#allocation5 + $0xc0] sm:$0xf]  ;;  %v2018_v31 = vor.u32 %v2789_v18, %v2017_v17 }
  0x50   : > { %1288 = vmatpush.bf16.msra.mxu1 %v2150_v57  ;;  %v2813_v22 = vld [vmem:[#allocation5 + $0xc8] sm:$0xf0]  ;;  %v2209_v23 = vld [vmem:[#allocation5 + $0x180] sm:$0xf]  ;;  %v2318_v24 = vor.u32 %v2864_v15, %v2317_v14  ;;  %v2485_v26 = vld [vmem:[#allocation5 + $0x3a8] sm:$0xf] }
  0x51   : > { %1301 = vmatpush.bf16.msra.mxu2 %v2246_v58  ;;  %v2837_v25 = vld [vmem:[#allocation5 + $0x188] sm:$0xf0]  ;;  %v2906_v27 = vld [vmem:[#allocation5 + $0x3b0] sm:$0xf0]  ;;  %v2581_v28 = vld [vmem:[#allocation5 + $0x468] sm:$0xf]  ;;  %v2114_v35 = vor.u32 %v2813_v22, %v2113_v21 }
  0x52   : > { %1314 = vmatpush.bf16.msra.mxu3 %v2342_v62  ;;  %v2930_v29 = vld [vmem:[#allocation5 + $0x470] sm:$0xf0]  ;;  %v2809_v30 = vld [vmem:[#allocation5 + $0xac] sm:$0xf]  ;;  %v2103_v32 = vld [vmem:[#allocation5 + $0xb4] sm:$0xf0]  ;;  %v2210_v36 = vor.u32 %v2837_v25, %v2209_v23  ;;  %v2486_v39 = vor.u32 %v2906_v27, %v2485_v26 }
  0x53   : > { %1276 = vmatpush.bf16.msra.mxu0 %v2042_v4  ;;  %v2305_v33 = vld [vmem:[#allocation5 + $0x240] sm:$0xf]  ;;  %v2861_v34 = vld [vmem:[#allocation5 + $0x248] sm:$0xf0]  ;;  %v2199_v38 = vld [vmem:[#allocation5 + $0x174] sm:$0xf0]  ;;  %v2582_v40 = vor.u32 %v2930_v29, %v2581_v28  ;;  %v2106_v42 = vor.u32 %v2809_v30, %v2103_v32 }
  0x54   : > { %1289 = vmatpush.bf16.msra.mxu1 %v2138_v5  ;;  %v2833_v37 = vld [vmem:[#allocation5 + $0x16c] sm:$0xf]  ;;  %v2473_v41 = vld [vmem:[#allocation5 + $0x390] sm:$0xf]  ;;  %v2306_v43 = vor.u32 %v2861_v34, %v2305_v33  ;;  %v2903_v44 = vld [vmem:[#allocation5 + $0x398] sm:$0xf0] }
  0x55   : > { %1302 = vmatpush.bf16.msra.mxu2 %v2234_v6  ;;  %v2569_v45 = vld [vmem:[#allocation5 + $0x450] sm:$0xf]  ;;  %v2927_v46 = vld [vmem:[#allocation5 + $0x458] sm:$0xf0]  ;;  %v2202_v47 = vor.u32 %v2833_v37, %v2199_v38  ;;  %v2806_v48 = vld [vmem:[#allocation5 + $0x94] sm:$0xf]  ;;  %v2474_v53 = vor.u32 %v2903_v44, %v2473_v41 }
  0x56   : > { %1315 = vmatpush.bf16.msra.mxu3 %v2330_v10  ;;  %v2091_v49 = vld [vmem:[#allocation5 + $0x9c] sm:$0xf0]  ;;  %v2830_v50 = vld [vmem:[#allocation5 + $0x154] sm:$0xf]  ;;  %v2570_v54 = vor.u32 %v2927_v46, %v2569_v45  ;;  %v2461_v55 = vld [vmem:[#allocation5 + $0x378] sm:$0xf] }
  0x57   : > { %1277 = vmatpush.bf16.msra.mxu0 %v2030_v16  ;;  %v2187_v51 = vld [vmem:[#allocation5 + $0x15c] sm:$0xf0]  ;;  %v2900_v56 = vld [vmem:[#allocation5 + $0x380] sm:$0xf0]  ;;  %v2094_v58 = vor.u32 %v2806_v48, %v2091_v49  ;;  %v2557_v59 = vld [vmem:[#allocation5 + $0x438] sm:$0xf] }
  0x58   : > { %1290 = vmatpush.bf16.msra.mxu1 %v2126_v19  ;;  %v291_v52 = vld [vmem:[%s3409_s13] sm:$0xff]  ;;  %v292_v61 = vld [vmem:[%s3409_s13 + $0x8] sm:$0xff]  ;;  %v2190_v62 = vor.u32 %v2830_v50, %v2187_v51  ;;  %v2462_v4 = vor.u32 %v2900_v56, %v2461_v55  ;;  %v293_v8 = vld [vmem:[%s3409_s13 + $0x10] sm:$0xff]  ;;  %s2014_s30 = sshll.u32 %s3405_s7, 4  ;;  %s2980_s10 = sshll.u32 %s3322_s25, 4 }
  0x59   : > { %1303 = vmatpush.bf16.msra.mxu2 %v2222_v20  ;;  %v3424_v57 = vpack.c.bf16 %v291_v52, %v291_v52  ;;  %v2924_v60 = vld [vmem:[#allocation5 + $0x440] sm:$0xf0]  ;;  %v2803_v63 = vld [vmem:[#allocation5 + $0x7c] sm:$0xf]  ;;  %v2079_v0 = vld [vmem:[#allocation5 + $0x84] sm:$0xf0]  ;;  %v3428_v1 = vpack.c.bf16 %v292_v61, %v292_v61  ;;  %v3432_v12 = vpack.c.bf16 %v293_v8, %v293_v8  ;;  %s1899_s16 = scalar_lea.hbm %s3506_s5, %s2980_s10 }
  0x5a   : > { %1316 = vmatpush.bf16.msra.mxu3 %v2318_v24  ;;  %v2827_v2 = vld [vmem:[#allocation5 + $0x13c] sm:$0xf]  ;;  %v2175_v3 = vld [vmem:[#allocation5 + $0x144] sm:$0xf0]  ;;  %v2558_v5 = vor.u32 %v2924_v60, %v2557_v59  ;;  %v2449_v6 = vld [vmem:[#allocation5 + $0x360] sm:$0xf]  ;;  %v2082_v9 = vor.u32 %v2803_v63, %v2079_v0 }
  0x5b   : > { %1278 = vmatpush.bf16.msra.mxu0 %v2018_v31  ;;  %v2897_v7 = vld [vmem:[#allocation5 + $0x368] sm:$0xf0]  ;;  %v2545_v10 = vld [vmem:[#allocation5 + $0x420] sm:$0xf]  ;;  %v2178_v14 = vor.u32 %v2827_v2, %v2175_v3  ;;  %v2800_v15 = vld [vmem:[#allocation5 + $0x64] sm:$0xf] }
  0x5c   : > { %1291 = vmatpush.bf16.msra.mxu1 %v2114_v35  ;;  %v2921_v11 = vld [vmem:[#allocation5 + $0x428] sm:$0xf0]  ;;  %v2067_v16 = vld [vmem:[#allocation5 + $0x6c] sm:$0xf0]  ;;  %v2824_v18 = vld [vmem:[#allocation5 + $0x124] sm:$0xf]  ;;  %v2450_v20 = vor.u32 %v2897_v7, %v2449_v6 }
  0x5d   : > { %1304 = vmatpush.bf16.msra.mxu2 %v2210_v36  ;;  %v294_v13 = vld [vmem:[%s3409_s13 + $0x18] sm:$0xff]  ;;  %v2163_v19 = vld [vmem:[#allocation5 + $0x12c] sm:$0xf0]  ;;  %v2546_v21 = vor.u32 %v2921_v11, %v2545_v10  ;;  %v2070_v23 = vor.u32 %v2800_v15, %v2067_v16  ;;  %v2894_v24 = vld [vmem:[#allocation5 + $0x350] sm:$0xf0]  ;;  %s290_s17 = scalar_lea.vmem [#allocation10], %s2014_s30 }
  0x5e   : > { %1317 = vmatpush.bf16.msra.mxu3 %v2306_v43  ;;  %1279 = vmatmul.bf16.vlgmr.msra.gmra.mxu0 %v3424_v57  ;;  %v3435_v17 = vpack.c.bf16 %v294_v13, %v294_v13  ;;  %v2437_v22 = vld [vmem:[#allocation5 + $0x348] sm:$0xf]  ;;  %v2918_v26 = vld [vmem:[#allocation5 + $0x410] sm:$0xf0]  ;;  %v2166_v27 = vor.u32 %v2824_v18, %v2163_v19  ;;  %v2797_v28 = vld [vmem:[#allocation5 + $0x4c] sm:$0xf] }
  0x5f   : > { %1323 = vmatpush.bf16.msrb.mxu0 %v2486_v39  ;;  %1292 = vmatmul.bf16.vlgmr.msra.gmra.mxu1 %v3428_v1  ;;  %v2533_v25 = vld [vmem:[#allocation5 + $0x408] sm:$0xf]  ;;  %v2055_v29 = vld [vmem:[#allocation5 + $0x54] sm:$0xf0]  ;;  %v2821_v30 = vld [vmem:[#allocation5 + $0x10c] sm:$0xf]  ;;  %v2438_v32 = vor.u32 %v2894_v24, %v2437_v22 }
  0x60   : > { %1336 = vmatpush.bf16.msrb.mxu1 %v2582_v40  ;;  %1305 = vmatmul.bf16.vlgmr.msra.gmra.mxu2 %v3432_v12  ;;  %v2151_v31 = vld [vmem:[#allocation5 + $0x114] sm:$0xf0]  ;;  %v2534_v33 = vor.u32 %v2918_v26, %v2533_v25  ;;  %v2425_v34 = vld [vmem:[#allocation5 + $0x330] sm:$0xf]  ;;  %v2058_v35 = vor.u32 %v2797_v28, %v2055_v29  ;;  %v2891_v36 = vld [vmem:[#allocation5 + $0x338] sm:$0xf0] }
  0x61   : > { %1349 = vmatpush.bf16.msrb.mxu2 %v2106_v42  ;;  %1318 = vmatmul.bf16.vlgmr.msra.gmra.mxu3 %v3435_v17  ;;  %v2521_v37 = vld [vmem:[#allocation5 + $0x3f0] sm:$0xf]  ;;  %v2915_v38 = vld [vmem:[#allocation5 + $0x3f8] sm:$0xf0]  ;;  %v2154_v39 = vor.u32 %v2821_v30, %v2151_v31  ;;  %v2794_v40 = vld [vmem:[#allocation5 + $0x34] sm:$0xf]  ;;  %v2426_v44 = vor.u32 %v2891_v36, %v2425_v34 }
  0x62   : > { %1362 = vmatpush.bf16.msrb.mxu3 %v2202_v47  ;;  %v2043_v41 = vld [vmem:[#allocation5 + $0x3c] sm:$0xf0]  ;;  %v2818_v42 = vld [vmem:[#allocation5 + $0xf4] sm:$0xf]  ;;  %v2522_v45 = vor.u32 %v2915_v38, %v2521_v37  ;;  %v2413_v46 = vld [vmem:[#allocation5 + $0x318] sm:$0xf] }
  0x63   : > { %1324 = vmatpush.bf16.msrb.mxu0 %v2474_v53  ;;  %v2139_v43 = vld [vmem:[#allocation5 + $0xfc] sm:$0xf0]  ;;  %v2046_v47 = vor.u32 %v2794_v40, %v2043_v41  ;;  %v2888_v48 = vld [vmem:[#allocation5 + $0x320] sm:$0xf0]  ;;  %v2509_v49 = vld [vmem:[#allocation5 + $0x3d8] sm:$0xf] }
  0x64   : > { %1337 = vmatpush.bf16.msrb.mxu1 %v2570_v54  ;;  %v2912_v50 = vld [vmem:[#allocation5 + $0x3e0] sm:$0xf0]  ;;  %v2142_v51 = vor.u32 %v2818_v42, %v2139_v43  ;;  %v2791_v52 = vld [vmem:[#allocation5 + $0x1c] sm:$0xf]  ;;  %v2031_v53 = vld [vmem:[#allocation5 + $0x24] sm:$0xf0]  ;;  %v2414_v56 = vor.u32 %v2888_v48, %v2413_v46 }
  0x65   : > { %1350 = vmatpush.bf16.msrb.mxu2 %v2094_v58  ;;  %v2815_v54 = vld [vmem:[#allocation5 + $0xdc] sm:$0xf]  ;;  %v2127_v55 = vld [vmem:[#allocation5 + $0xe4] sm:$0xf0]  ;;  %v2510_v58 = vor.u32 %v2912_v50, %v2509_v49  ;;  %v2401_v59 = vld [vmem:[#allocation5 + $0x300] sm:$0xf] }
  0x66   : > { %1363 = vmatpush.bf16.msrb.mxu3 %v2190_v62  ;;  %v2885_v60 = vld [vmem:[#allocation5 + $0x308] sm:$0xf0]  ;;  %v2497_v61 = vld [vmem:[#allocation5 + $0x3c0] sm:$0xf]  ;;  %v2034_v62 = vor.u32 %v2791_v52, %v2031_v53  ;;  %v2788_v0 = vld [vmem:[#allocation5 + $0x4] sm:$0xf]  ;;  %v2130_v3 = vor.u32 %v2815_v54, %v2127_v55 }
  0x67   : > { %1325 = vmatpush.bf16.msrb.mxu0 %v2462_v4  ;;  %v2909_v63 = vld [vmem:[#allocation5 + $0x3c8] sm:$0xf0]  ;;  %v2019_v2 = vld [vmem:[#allocation5 + $0xc] sm:$0xf0]  ;;  %v2391_v7 = vld [vmem:[#allocation5 + $0x2f4] sm:$0xf0]  ;;  %v2402_v10 = vor.u32 %v2885_v60, %v2401_v59 }
  0x68   : > { %1338 = vmatpush.bf16.msrb.mxu1 %v2558_v5  ;;  %v2857_v4 = vld [vmem:[#allocation5 + $0x22c] sm:$0xf]  ;;  %v2295_v5 = vld [vmem:[#allocation5 + $0x234] sm:$0xf0]  ;;  %v2498_v11 = vor.u32 %v2909_v63, %v2497_v61  ;;  %v2812_v13 = vld [vmem:[#allocation5 + $0xc4] sm:$0xf]  ;;  %v2022_v16 = vor.u32 %v2788_v0, %v2019_v2 }
  0x69   : > { %1351 = vmatpush.bf16.msrb.mxu2 %v2082_v9  ;;  %v2881_v6 = vld [vmem:[#allocation5 + $0x2ec] sm:$0xf]  ;;  %v2487_v9 = vld [vmem:[#allocation5 + $0x3b4] sm:$0xf0]  ;;  %v295_v15 = vld [vmem:[%s3409_s13 + $0x20] sm:$0xff]  ;;  %v2298_v18 = vor.u32 %v2857_v4, %v2295_v5  ;;  %s1901_s22 = sshll.u32 %s290_s17, 4  ;;  %s1902_s22 = int_to_ptr.vmem [resolvable:$true] %s1901_s22 }
  0x6a   : > { %1364 = vmatpush.bf16.msrb.mxu3 %v2178_v14  ;;  %v2905_v8 = vld [vmem:[#allocation5 + $0x3ac] sm:$0xf]  ;;  %v2115_v14 = vld [vmem:[#allocation5 + $0xcc] sm:$0xf0]  ;;  %v2394_v22 = vor.u32 %v2881_v6, %v2391_v7  ;;  %v2854_v24 = vld [vmem:[#allocation5 + $0x214] sm:$0xf]  ;;  %v3441_v28 = vpack.c.bf16 %v295_v15, %v295_v15 }
  0x6b   : > { %1326 = vmatpush.bf16.msrb.mxu0 %v2450_v20  ;;  %v2929_v19 = vld [vmem:[#allocation5 + $0x46c] sm:$0xf]  ;;  %v2583_v20 = vld [vmem:[#allocation5 + $0x474] sm:$0xf0]  ;;  %v2283_v25 = vld [vmem:[#allocation5 + $0x21c] sm:$0xf0] }
  0x6c   : > { %1339 = vmatpush.bf16.msrb.mxu1 %v2546_v21  ;;  %v296_v21 = vld [vmem:[%s3409_s13 + $0x28] sm:$0xff]  ;;  %v2878_v26 = vld [vmem:[#allocation5 + $0x2d4] sm:$0xf]  ;;  %v2379_v29 = vld [vmem:[#allocation5 + $0x2dc] sm:$0xf0]  ;;  %v2286_v34 = vor.u32 %v2854_v24, %v2283_v25  ;;  %s1903_s23 = sshll.u32 %s1899_s16, 4  ;;  %s1904_s23 = int_to_ptr.hbm [resolvable:$true] %s1903_s23 }
  0x6d   : > { %1352 = vmatpush.bf16.msrb.mxu2 %v2070_v23  ;;  %v2490_v23 = vor.u32 %v2905_v8, %v2487_v9  ;;  %v2902_v30 = vld [vmem:[#allocation5 + $0x394] sm:$0xf]  ;;  %v2475_v31 = vld [vmem:[#allocation5 + $0x39c] sm:$0xf0]  ;;  %v2382_v37 = vor.u32 %v2878_v26, %v2379_v29  ;;  %v2271_v40 = vld [vmem:[#allocation5 + $0x204] sm:$0xf0] }
  0x6e   : > { %1365 = vmatpush.bf16.msrb.mxu3 %v2166_v27  ;;  %v2118_v27 = vor.u32 %v2812_v13, %v2115_v14  ;;  %v2571_v36 = vld [vmem:[#allocation5 + $0x45c] sm:$0xf0]  ;;  %v2478_v38 = vor.u32 %v2902_v30, %v2475_v31  ;;  %v2875_v41 = vld [vmem:[#allocation5 + $0x2bc] sm:$0xf]  ;;  %v2367_v42 = vld [vmem:[#allocation5 + $0x2c4] sm:$0xf0] }
  0x6f   : > { %1327 = vmatpush.bf16.msrb.mxu0 %v2438_v32  ;;  %v2586_v32 = vor.u32 %v2929_v19, %v2583_v20  ;;  %v2899_v43 = vld [vmem:[#allocation5 + $0x37c] sm:$0xf]  ;;  %v2559_v48 = vld [vmem:[#allocation5 + $0x444] sm:$0xf0]  ;;  %v2370_v49 = vor.u32 %v2875_v41, %v2367_v42  ;;  %v2259_v52 = vld [vmem:[#allocation5 + $0x1ec] sm:$0xf0] }
  0x70   : > { %1340 = vmatpush.bf16.msrb.mxu1 %v2534_v33  ;;  %v3443_v33 = vpack.c.bf16 %v296_v21, %v296_v21  ;;  %v2872_v53 = vld [vmem:[#allocation5 + $0x2a4] sm:$0xf]  ;;  %v2355_v54 = vld [vmem:[#allocation5 + $0x2ac] sm:$0xf0]  ;;  %v2845_v0 = vld [vmem:[#allocation5 + $0x1cc] sm:$0xf] }
  0x71   : > { %1353 = vmatpush.bf16.msrb.mxu2 %v2058_v35  ;;  %v2926_v35 = vld [vmem:[#allocation5 + $0x454] sm:$0xf]  ;;  %v2896_v55 = vld [vmem:[#allocation5 + $0x364] sm:$0xf]  ;;  %v2547_v61 = vld [vmem:[#allocation5 + $0x42c] sm:$0xf0] }
  0x72   : > { %1366 = vmatpush.bf16.msrb.mxu3 %v2154_v39  ;;  %v2851_v39 = vld [vmem:[#allocation5 + $0x1fc] sm:$0xf]  ;;  %v2920_v60 = vld [vmem:[#allocation5 + $0x424] sm:$0xf]  ;;  %v2247_v2 = vld [vmem:[#allocation5 + $0x1d4] sm:$0xf0] }
  0x73   : > { %1328 = vmatpush.bf16.msrb.mxu0 %v2426_v44  ;;  %v2463_v44 = vld [vmem:[#allocation5 + $0x384] sm:$0xf0]  ;;  %v2274_v46 = vor.u32 %v2851_v39, %v2271_v40  ;;  %v2343_v4 = vld [vmem:[#allocation5 + $0x294] sm:$0xf0]  ;;  %v2893_v5 = vld [vmem:[#allocation5 + $0x34c] sm:$0xf]  ;;  %v2550_v7 = vor.u32 %v2920_v60, %v2547_v61  ;;  %v2250_v8 = vor.u32 %v2845_v0, %v2247_v2 }
  0x74   : > { %1341 = vmatpush.bf16.msrb.mxu1 %v2522_v45  ;;  %v2574_v45 = vor.u32 %v2926_v35, %v2571_v36  ;;  %v2466_v50 = vor.u32 %v2899_v43, %v2463_v44  ;;  %v2439_v6 = vld [vmem:[#allocation5 + $0x354] sm:$0xf0]  ;;  %v2917_v9 = vld [vmem:[#allocation5 + $0x40c] sm:$0xf]  ;;  %v2842_v14 = vld [vmem:[#allocation5 + $0x1b4] sm:$0xf] }
  0x75   : > { %1354 = vmatpush.bf16.msrb.mxu2 %v2046_v47  ;;  %v2923_v47 = vld [vmem:[#allocation5 + $0x43c] sm:$0xf]  ;;  %v2442_v13 = vor.u32 %v2893_v5, %v2439_v6  ;;  %v2235_v15 = vld [vmem:[#allocation5 + $0x1bc] sm:$0xf0]  ;;  %v2890_v19 = vld [vmem:[#allocation5 + $0x334] sm:$0xf] }
  0x76   : > { %1367 = vmatpush.bf16.msrb.mxu3 %v2142_v51  ;;  %v2848_v51 = vld [vmem:[#allocation5 + $0x1e4] sm:$0xf]  ;;  %v2427_v20 = vld [vmem:[#allocation5 + $0x33c] sm:$0xf0]  ;;  %v2223_v29 = vld [vmem:[#allocation5 + $0x1a4] sm:$0xf0] }
  0x77   : > { %1329 = vmatpush.bf16.msrb.mxu0 %v2414_v56  ;;  %v2451_v56 = vld [vmem:[#allocation5 + $0x36c] sm:$0xf0]  ;;  %v2262_v59 = vor.u32 %v2848_v51, %v2259_v52  ;;  %v2523_v24 = vld [vmem:[#allocation5 + $0x3fc] sm:$0xf0]  ;;  %v2430_v26 = vor.u32 %v2890_v19, %v2427_v20  ;;  %v2863_v30 = vld [vmem:[#allocation5 + $0x25c] sm:$0xf] }
  0x78   : > { %1342 = vmatpush.bf16.msrb.mxu1 %v2510_v58  ;;  %v2562_v58 = vor.u32 %v2923_v47, %v2559_v48  ;;  %v2454_v63 = vor.u32 %v2896_v55, %v2451_v56  ;;  %v2319_v31 = vld [vmem:[#allocation5 + $0x264] sm:$0xf0]  ;;  %v2836_v39 = vld [vmem:[#allocation5 + $0x184] sm:$0xf]  ;;  %v2211_v42 = vld [vmem:[#allocation5 + $0x18c] sm:$0xf0] }
  0x79   : > { %1355 = vmatpush.bf16.msrb.mxu2 %v2034_v62  ;;  %v2358_v62 = vor.u32 %v2872_v53, %v2355_v54  ;;  %v2322_v40 = vor.u32 %v2863_v30, %v2319_v31  ;;  %v2860_v43 = vld [vmem:[#allocation5 + $0x244] sm:$0xf]  ;;  %v2307_v44 = vld [vmem:[#allocation5 + $0x24c] sm:$0xf0]  ;;  %v2835_v51 = vld [vmem:[#allocation5 + $0x178] sm:$0xf0]  ;;  %v2214_v52 = vor.u32 %v2836_v39, %v2211_v42 }
  0x7a   : > { %1368 = vmatpush.bf16.msrb.mxu3 %v2130_v3  ;;  %v2869_v3 = vld [vmem:[#allocation5 + $0x28c] sm:$0xf]  ;;  %v2109_v47 = vld [vmem:[#allocation5 + $0xb0] sm:$0xf]  ;;  %v2908_v53 = vld [vmem:[#allocation5 + $0x3c4] sm:$0xf]  ;;  %v2310_v55 = vor.u32 %v2860_v43, %v2307_v44 }
  0x7b   : > { %1330 = vmatpush.bf16.msrb.mxu0 %v2402_v10  ;;  %v2535_v10 = vld [vmem:[#allocation5 + $0x414] sm:$0xf0]  ;;  %v2499_v54 = vld [vmem:[#allocation5 + $0x3cc] sm:$0xf0]  ;;  %v2859_v61 = vld [vmem:[#allocation5 + $0x238] sm:$0xf0] }
  0x7c   : > { %1343 = vmatpush.bf16.msrb.mxu1 %v2498_v11  ;;  %v2346_v11 = vor.u32 %v2869_v3, %v2343_v4  ;;  %v2538_v21 = vor.u32 %v2917_v9, %v2535_v10  ;;  %v2502_v0 = vor.u32 %v2908_v53, %v2499_v54  ;;  %v2097_v2 = vld [vmem:[#allocation5 + $0x98] sm:$0xf]  ;;  %v2808_v3 = vld [vmem:[#allocation5 + $0xa0] sm:$0xf0]  ;;  %v2829_v19 = vld [vmem:[#allocation5 + $0x148] sm:$0xf0] }
  0x7d   : > { %1356 = vmatpush.bf16.msrb.mxu2 %v2022_v16  ;;  %v2866_v16 = vld [vmem:[#allocation5 + $0x274] sm:$0xf]  ;;  %v2193_v4 = vld [vmem:[#allocation5 + $0x158] sm:$0xf]  ;;  %v2832_v5 = vld [vmem:[#allocation5 + $0x160] sm:$0xf0]  ;;  %v2098_v9 = vor.u32 %v2808_v3, %v2097_v2 }
  0x7e   : > { %1369 = vmatpush.bf16.msrb.mxu3 %v2118_v27  ;;  %1331 = vmatmul.bf16.vlgmr.msrb.gmra.mxu0 %v3441_v28  ;;  %v2839_v27 = vld [vmem:[#allocation5 + $0x19c] sm:$0xf]  ;;  %v2856_v10 = vld [vmem:[#allocation5 + $0x220] sm:$0xf0]  ;;  %v2802_v30 = vld [vmem:[#allocation5 + $0x70] sm:$0xf0] }
  0x7f   : > { %1375 = vmatpush.bf16.msra.mxu0 %v2298_v18  ;;  %1344 = vmatmul.bf16.vlgmr.msrb.gmra.mxu1 %v3443_v33  ;;  %v2331_v18 = vld [vmem:[#allocation5 + $0x27c] sm:$0xf0]  ;;  %v2226_v36 = vor.u32 %v2839_v27, %v2223_v29  ;;  %v2073_v29 = vld [vmem:[#allocation5 + $0x68] sm:$0xf]  ;;  %v2061_v42 = vld [vmem:[#allocation5 + $0x50] sm:$0xf] }
  0x80   : > { %1388 = vmatpush.bf16.msra.mxu1 %v2394_v22  ;;  %1357 = vmatmul.bf16.vlgmr.msrb.gmra.mxu2 %v3424_v57  ;;  %v2238_v22 = vor.u32 %v2842_v14, %v2235_v15  ;;  %v2334_v25 = vor.u32 %v2866_v16, %v2331_v18  ;;  %v2194_v14 = vor.u32 %v2832_v5, %v2193_v4  ;;  %v2085_v15 = vld [vmem:[#allocation5 + $0x80] sm:$0xf]  ;;  %v2805_v16 = vld [vmem:[#allocation5 + $0x88] sm:$0xf0]  ;;  %v2169_v31 = vld [vmem:[#allocation5 + $0x128] sm:$0xf] }
  0x81   : > { %1401 = vmatpush.bf16.msra.mxu2 %v2490_v23  ;;  %1370 = vmatmul.bf16.vlgmr.msrb.gmra.mxu3 %v3428_v1  ;;  %v2914_v23 = vld [vmem:[#allocation5 + $0x3f4] sm:$0xf]  ;;  %v2181_v18 = vld [vmem:[#allocation5 + $0x140] sm:$0xf]  ;;  %v2361_v39 = vld [vmem:[#allocation5 + $0x2a8] sm:$0xf] }
  0x82   : > { %1414 = vmatpush.bf16.msra.mxu3 %v2586_v32  ;;  %v2887_v32 = vld [vmem:[#allocation5 + $0x31c] sm:$0xf]  ;;  %v2526_v35 = vor.u32 %v2914_v23, %v2523_v24  ;;  %v2086_v23 = vor.u32 %v2805_v16, %v2085_v15  ;;  %v2853_v24 = vld [vmem:[#allocation5 + $0x208] sm:$0xf0]  ;;  %v2182_v27 = vor.u32 %v2829_v19, %v2181_v18  ;;  %v2157_v44 = vld [vmem:[#allocation5 + $0x110] sm:$0xf] }
  0x83   : > { %1376 = vmatpush.bf16.msra.mxu0 %v2286_v34  ;;  %v2415_v34 = vld [vmem:[#allocation5 + $0x324] sm:$0xf0]  ;;  %v2799_v43 = vld [vmem:[#allocation5 + $0x58] sm:$0xf0]  ;;  %v2049_v54 = vld [vmem:[#allocation5 + $0x38] sm:$0xf] }
  0x84   : > { %1389 = vmatpush.bf16.msra.mxu1 %v2382_v37  ;;  %v2911_v37 = vld [vmem:[#allocation5 + $0x3dc] sm:$0xf]  ;;  %v2418_v41 = vor.u32 %v2887_v32, %v2415_v34  ;;  %v2826_v32 = vld [vmem:[#allocation5 + $0x130] sm:$0xf0]  ;;  %v2868_v2 = vld [vmem:[#allocation5 + $0x280] sm:$0xf0] }
  0x85   : > { %1402 = vmatpush.bf16.msra.mxu2 %v2478_v38  ;;  %v2511_v38 = vld [vmem:[#allocation5 + $0x3e4] sm:$0xf0]  ;;  %v2037_v4 = vld [vmem:[#allocation5 + $0x20] sm:$0xf]  ;;  %v2793_v5 = vld [vmem:[#allocation5 + $0x28] sm:$0xf0] }
  0x86   : > { %1415 = vmatpush.bf16.msra.mxu3 %v2574_v45  ;;  %v2884_v45 = vld [vmem:[#allocation5 + $0x304] sm:$0xf]  ;;  %v2514_v48 = vor.u32 %v2911_v37, %v2511_v38  ;;  %v2074_v37 = vor.u32 %v2802_v30, %v2073_v29  ;;  %v2850_v38 = vld [vmem:[#allocation5 + $0x1f0] sm:$0xf0]  ;;  %v2865_v15 = vld [vmem:[#allocation5 + $0x268] sm:$0xf0] }
  0x87   : > { %1377 = vmatpush.bf16.msra.mxu0 %v2274_v46  ;;  %v2403_v46 = vld [vmem:[#allocation5 + $0x30c] sm:$0xf0]  ;;  %v2025_v18 = vld [vmem:[#allocation5 + $0x8] sm:$0xf]  ;;  %v2790_v19 = vld [vmem:[#allocation5 + $0x10] sm:$0xf0] }
  0x88   : > { %1390 = vmatpush.bf16.msra.mxu1 %v2370_v49  ;;  %v2811_v49 = vld [vmem:[#allocation5 + $0xb8] sm:$0xf0]  ;;  %v2406_v56 = vor.u32 %v2884_v45, %v2403_v46  ;;  %v2026_v29 = vor.u32 %v2790_v19, %v2025_v18  ;;  %v2217_v30 = vld [vmem:[#allocation5 + $0x188] sm:$0xf]  ;;  %v2421_v18 = vld [vmem:[#allocation5 + $0x320] sm:$0xf] }
  0x89   : > { %1403 = vmatpush.bf16.msra.mxu2 %v2466_v50  ;;  %v2205_v50 = vld [vmem:[#allocation5 + $0x170] sm:$0xf]  ;;  %v2823_v45 = vld [vmem:[#allocation5 + $0x118] sm:$0xf0]  ;;  %v2889_v19 = vld [vmem:[#allocation5 + $0x328] sm:$0xf0] }
  0x8a   : > { %1416 = vmatpush.bf16.msra.mxu3 %v2562_v58  ;;  %v2301_v58 = vld [vmem:[#allocation5 + $0x230] sm:$0xf]  ;;  %v2206_v60 = vor.u32 %v2835_v51, %v2205_v50  ;;  %v2847_v50 = vld [vmem:[#allocation5 + $0x1d8] sm:$0xf0]  ;;  %v2158_v53 = vor.u32 %v2823_v45, %v2157_v44  ;;  %v2469_v45 = vld [vmem:[#allocation5 + $0x380] sm:$0xf] }
  0x8b   : > { %1378 = vmatpush.bf16.msra.mxu0 %v2262_v59  ;;  %v2110_v59 = vor.u32 %v2811_v49, %v2109_v47  ;;  %v2302_v6 = vor.u32 %v2859_v61, %v2301_v58  ;;  %v2062_v49 = vor.u32 %v2799_v43, %v2061_v42  ;;  %v2349_v51 = vld [vmem:[#allocation5 + $0x290] sm:$0xf]  ;;  %v2820_v58 = vld [vmem:[#allocation5 + $0x100] sm:$0xf0]  ;;  %v2241_v61 = vld [vmem:[#allocation5 + $0x1b8] sm:$0xf] }
  0x8c   : > { %1391 = vmatpush.bf16.msra.mxu1 %v2358_v62  ;;  %v2397_v62 = vld [vmem:[#allocation5 + $0x2f0] sm:$0xf]  ;;  %s1888_s25 = scalar_lea.sflag [#allocation4], %s3405_s7  ;;  %s3199_s27 = sshra.s32 %s1904_s23, 4  ;;  %s3200_s27 = int_to_ptr.hbm [resolvable:$true] %s3199_s27 }
  0x8d   : > { %1404 = vmatpush.bf16.msra.mxu2 %v2454_v63  ;;  %v2883_v63 = vld [vmem:[#allocation5 + $0x2f8] sm:$0xf0]  ;;  %s3201_s28 = scalar_lea.hbm %s3200_s27, 16  ;;  %s3205_s1 = scalar_lea.hbm %s3506_s5, 32 }
  0x8e   : > { %1417 = vmatpush.bf16.msra.mxu3 %v2550_v7  ;;  %v2398_v7 = vor.u32 %v2883_v63, %v2397_v62  ;;  %v2844_v63 = vld [vmem:[#allocation5 + $0x1c0] sm:$0xf0]  ;;  %p3202_p1 = scmp.ne.s32.totalorder %s3200_s27, %s3201_s28  ;;  %p3206_p13 = scmp.lt.s32.totalorder %s3200_s27, %s3506_s5 }
  0x8f   : > { %1379 = vmatpush.bf16.msra.mxu0 %v2250_v8  ;;  %v2289_v8 = vld [vmem:[#allocation5 + $0x218] sm:$0xf]  ;;  %p3207_p8 = scmp.lt.s32.totalorder %s3205_s1, %s3201_s28 }
  0x90   : > { %1392 = vmatpush.bf16.msra.mxu1 %v2346_v11  ;;  %v2385_v11 = vld [vmem:[#allocation5 + $0x2d8] sm:$0xf]  ;;  %v2290_v20 = vor.u32 %v2856_v10, %v2289_v8  ;;  %v2242_v8 = vor.u32 %v2844_v63, %v2241_v61  ;;  %v2229_v10 = vld [vmem:[#allocation5 + $0x1a0] sm:$0xf]  ;;  %v2553_v61 = vld [vmem:[#allocation5 + $0x428] sm:$0xf]  ;;  %p3203_p3 = pnand %p3202_p1, %p3374_p0 }
  0x91   : > { %1405 = vmatpush.bf16.msra.mxu2 %v2442_v13  ;;  %v2880_v13 = vld [vmem:[#allocation5 + $0x2e0] sm:$0xf0]  ;;  %v2445_v63 = vld [vmem:[#allocation5 + $0x350] sm:$0xf]  ;;  %p3208_p7 = por %p3207_p8, %p3206_p13 }
  0x92   : > { %1418 = vmatpush.bf16.msra.mxu3 %v2538_v21  ;;  %v2386_v21 = vor.u32 %v2880_v13, %v2385_v11  ;;  %v2038_v11 = vor.u32 %v2793_v5, %v2037_v4  ;;  %v2841_v13 = vld [vmem:[#allocation5 + $0x1a8] sm:$0xf0]  ;;  %v2633_v4 = vld [vmem:[#allocation8 + $0x50] sm:$0xf]  ;;  %v2943_v5 = vld [vmem:[#allocation8 + $0x54] sm:$0xf0]  ;;  %p3204_p5 = pneg %p3203_p3 }
  0x93   : > { %1380 = vmatpush.bf16.msra.mxu0 %v2238_v22  ;;  %v2277_v22 = vld [vmem:[#allocation5 + $0x200] sm:$0xf] }
  0x94   : > { %1393 = vmatpush.bf16.msra.mxu1 %v2334_v25  ;;  %v2373_v25 = vld [vmem:[#allocation5 + $0x2c0] sm:$0xf]  ;;  %v2278_v34 = vor.u32 %v2853_v24, %v2277_v22  ;;  %v2493_v22 = vld [vmem:[#allocation5 + $0x3b0] sm:$0xf]  ;;  %p3209_p9 = pnand %p3208_p7, %p3204_p5 }
  0x95   : > { %1406 = vmatpush.bf16.msra.mxu2 %v2430_v26  ;;  %v2877_v26 = vld [vmem:[#allocation5 + $0x2c8] sm:$0xf0]  ;;  %v2589_v24 = vld [vmem:[#allocation5 + $0x470] sm:$0xf] }
  0x96   : > { %1419 = vmatpush.bf16.msra.mxu3 %v2526_v35  ;;  %v2374_v35 = vor.u32 %v2877_v26, %v2373_v25  ;;  %v2931_v25 = vld [vmem:[#allocation5 + $0x478] sm:$0xf0]  ;;  %v2230_v26 = vor.u32 %v2841_v13, %v2229_v10  ;;  %v2433_v10 = vld [vmem:[#allocation5 + $0x338] sm:$0xf]  ;;  %v2916_v13 = vld [vmem:[#allocation5 + $0x400] sm:$0xf0] }
  0x97   : > { %1381 = vmatpush.bf16.msra.mxu0 %v2226_v36  ;;  %v2265_v36 = vld [vmem:[#allocation5 + $0x1e8] sm:$0xf] }
  0x98   : > { %1394 = vmatpush.bf16.msra.mxu1 %v2322_v40  ;;  %v2874_v40 = vld [vmem:[#allocation5 + $0x2b0] sm:$0xf0]  ;;  %v2266_v46 = vor.u32 %v2850_v38, %v2265_v36  ;;  %v2481_v38 = vld [vmem:[#allocation5 + $0x398] sm:$0xf] }
  0x99   : > { %1407 = vmatpush.bf16.msra.mxu2 %v2418_v41  ;;  %v2170_v41 = vor.u32 %v2826_v32, %v2169_v31  ;;  %v2362_v47 = vor.u32 %v2874_v40, %v2361_v39  ;;  %v2838_v31 = vld [vmem:[#allocation5 + $0x190] sm:$0xf0]  ;;  %v2904_v39 = vld [vmem:[#allocation5 + $0x3a0] sm:$0xf0]  ;;  %v2577_v40 = vld [vmem:[#allocation5 + $0x458] sm:$0xf] }
  0x9a   : > { %1420 = vmatpush.bf16.msra.mxu3 %v2514_v48  ;;  %v2253_v48 = vld [vmem:[#allocation5 + $0x1d0] sm:$0xf]  ;;  %v2862_v36 = vld [vmem:[#allocation5 + $0x250] sm:$0xf0]  ;;  %v2218_v42 = vor.u32 %v2838_v31, %v2217_v30  ;;  %v2482_v44 = vor.u32 %v2904_v39, %v2481_v38  ;;  %v2609_v30 = vld [vmem:[#allocation8 + $0x20] sm:$0xf] }
  0x9b   : > { %1382 = vmatpush.bf16.msra.mxu0 %v2214_v52  ;;  %v2871_v52 = vld [vmem:[#allocation5 + $0x298] sm:$0xf0]  ;;  %v2937_v31 = vld [vmem:[#allocation8 + $0x24] sm:$0xf0] }
  0x9c   : > { %1395 = vmatpush.bf16.msra.mxu1 %v2310_v55  ;;  %v2796_v55 = vld [vmem:[#allocation5 + $0x40] sm:$0xf0] }
  0x9d   : > { %1408 = vmatpush.bf16.msra.mxu2 %v2406_v56  ;;  %v2145_v56 = vld [vmem:[#allocation5 + $0xf8] sm:$0xf]  ;;  %v2050_v62 = vor.u32 %v2796_v55, %v2049_v54  ;;  %v2925_v54 = vld [vmem:[#allocation5 + $0x448] sm:$0xf0] }
  0x9e   : > { %1421 = vmatpush.bf16.msra.mxu3 %v2502_v0  ;;  %1383 = vmatmul.bf16.vlgmr.msra.gmra.mxu0 %v3432_v12  ;;  %v2337_v0 = vld [vmem:[#allocation5 + $0x278] sm:$0xf]  ;;  %v2146_v3 = vor.u32 %v2820_v58, %v2145_v56 }
  0x9f   : > { %1427 = vmatpush.bf16.msrb.mxu0 %v2110_v59  ;;  %1396 = vmatmul.bf16.vlgmr.msra.gmra.mxu1 %v3435_v17  ;;  %v2254_v59 = vor.u32 %v2847_v50, %v2253_v48 }
  0xa0   : > { %1440 = vmatpush.bf16.msrb.mxu1 %v2206_v60  ;;  %1409 = vmatmul.bf16.vlgmr.msra.gmra.mxu2 %v3441_v28  ;;  %v2350_v60 = vor.u32 %v2871_v52, %v2349_v51  ;;  %v2641_v51 = vld [vmem:[#allocation8 + $0x60] sm:$0xf]  ;;  %v2945_v52 = vld [vmem:[#allocation8 + $0x64] sm:$0xf0] }
  0xa1   : > { %1453 = vmatpush.bf16.msrb.mxu2 %v2302_v6  ;;  %1422 = vmatmul.bf16.vlgmr.msra.gmra.mxu3 %v3443_v33  ;;  %v2133_v6 = vld [vmem:[#allocation5 + $0xe0] sm:$0xf]  ;;  %v2642_v56 = vor.u32 %v2945_v52, %v2641_v51 }
  0xa2   : > { %1466 = vmatpush.bf16.msrb.mxu3 %v2398_v7  ;;  %v2817_v7 = vld [vmem:[#allocation5 + $0xe8] sm:$0xf0] }
  0xa3   : > { %1428 = vmatpush.bf16.msrb.mxu0 %v2098_v9  ;;  %v2338_v9 = vor.u32 %v2868_v2, %v2337_v0  ;;  %v2134_v16 = vor.u32 %v2817_v7, %v2133_v6  ;;  %v2895_v0 = vld [vmem:[#allocation5 + $0x358] sm:$0xf0]  ;;  %v2541_v2 = vld [vmem:[#allocation5 + $0x410] sm:$0xf]  ;;  %v2634_v7 = vor.u32 %v2943_v5, %v2633_v4  ;;  %v2715_v4 = vld [vmem:[#allocation8 + $0xf8] sm:$0xf0] }
  0xa4   : > { %1441 = vmatpush.bf16.msrb.mxu1 %v2194_v14  ;;  %v2325_v14 = vld [vmem:[#allocation5 + $0x260] sm:$0xf]  ;;  %v2446_v6 = vor.u32 %v2895_v0, %v2445_v63  ;;  %v2963_v63 = vld [vmem:[#allocation8 + $0xf4] sm:$0xf0]  ;;  %v2962_v0 = vld [vmem:[#allocation8 + $0xf4] sm:$0xf] }
  0xa5   : > { %1454 = vmatpush.bf16.msrb.mxu2 %v2290_v20  ;;  %v2121_v20 = vld [vmem:[#allocation5 + $0xc8] sm:$0xf]  ;;  %v2705_v5 = vld [vmem:[#allocation8 + $0xe0] sm:$0xf] }
  0xa6   : > { %1467 = vmatpush.bf16.msrb.mxu3 %v2386_v21  ;;  %v2814_v21 = vld [vmem:[#allocation5 + $0xd0] sm:$0xf0] }
  0xa7   : > { %1429 = vmatpush.bf16.msrb.mxu0 %v2086_v23  ;;  %v2907_v23 = vld [vmem:[#allocation5 + $0x3b8] sm:$0xf0]  ;;  %v2122_v32 = vor.u32 %v2814_v21, %v2121_v20  ;;  %v2517_v20 = vld [vmem:[#allocation5 + $0x3e0] sm:$0xf]  ;;  %v2913_v21 = vld [vmem:[#allocation5 + $0x3e8] sm:$0xf0] }
  0xa8   : > { %1442 = vmatpush.bf16.msrb.mxu1 %v2182_v27  ;;  %v2326_v27 = vor.u32 %v2865_v15, %v2325_v14 }
  0xa9   : > { %1455 = vmatpush.bf16.msrb.mxu2 %v2278_v34  ;;  %v2494_v34 = vor.u32 %v2907_v23, %v2493_v22  ;;  %v2617_v22 = vld [vmem:[#allocation8 + $0x30] sm:$0xf]  ;;  %v2939_v23 = vld [vmem:[#allocation8 + $0x34] sm:$0xf0] }
  0xaa   : > { %1468 = vmatpush.bf16.msrb.mxu3 %v2374_v35  ;;  %v2313_v35 = vld [vmem:[#allocation5 + $0x248] sm:$0xf] }
  0xab   : > { %1430 = vmatpush.bf16.msrb.mxu0 %v2074_v37  ;;  %v2590_v37 = vor.u32 %v2931_v25, %v2589_v24  ;;  %v2314_v43 = vor.u32 %v2862_v36, %v2313_v35  ;;  %v2618_v24 = vor.u32 %v2939_v23, %v2617_v22  ;;  %v2422_v25 = vor.u32 %v2889_v19, %v2421_v18  ;;  %v2946_v36 = vld [vmem:[#allocation8 + $0x74] sm:$0xf]  ;;  %v2932_v22 = vld [vmem:[#allocation8 + $0x4] sm:$0xf]  ;;  %v2595_v23 = vld [vmem:[#allocation8 + $0x8] sm:$0xf0] }
  0xac   : > { %1443 = vmatpush.bf16.msrb.mxu1 %v2170_v41  ;;  %v2928_v41 = vld [vmem:[#allocation5 + $0x460] sm:$0xf0]  ;;  %v2610_v35 = vor.u32 %v2937_v31, %v2609_v30  ;;  %v2957_v30 = vld [vmem:[#allocation8 + $0xc4] sm:$0xf0]  ;;  %v2598_v31 = vor.u32 %v2932_v22, %v2595_v23  ;;  %v2779_v23 = vld [vmem:[#allocation8 + $0x178] sm:$0xf0] }
  0xad   : > { %1456 = vmatpush.bf16.msrb.mxu2 %v2266_v46  ;;  %v2649_v46 = vld [vmem:[#allocation8 + $0x70] sm:$0xf]  ;;  %v2578_v48 = vor.u32 %v2928_v41, %v2577_v40  ;;  %v2944_v41 = vld [vmem:[#allocation8 + $0x64] sm:$0xf] }
  0xae   : > { %1469 = vmatpush.bf16.msrb.mxu3 %v2362_v47  ;;  %v2947_v47 = vld [vmem:[#allocation8 + $0x74] sm:$0xf0] }
  0xaf   : > { %1431 = vmatpush.bf16.msrb.mxu0 %v2062_v49  ;;  %v2901_v49 = vld [vmem:[#allocation5 + $0x388] sm:$0xf0]  ;;  %v2650_v50 = vor.u32 %v2947_v47, %v2649_v46  ;;  %v2940_v47 = vld [vmem:[#allocation8 + $0x44] sm:$0xf] }
  0xb0   : > { %1444 = vmatpush.bf16.msrb.mxu1 %v2158_v53  ;;  %v2565_v53 = vld [vmem:[#allocation5 + $0x440] sm:$0xf]  ;;  %v2470_v55 = vor.u32 %v2901_v49, %v2469_v45  ;;  %v2601_v49 = vld [vmem:[#allocation8 + $0x10] sm:$0xf] }
  0xb1   : > { %1457 = vmatpush.bf16.msrb.mxu2 %v2254_v59  ;;  %v2566_v58 = vor.u32 %v2925_v54, %v2565_v53  ;;  %v2457_v59 = vld [vmem:[#allocation5 + $0x368] sm:$0xf]  ;;  %v2635_v45 = vld [vmem:[#allocation8 + $0x58] sm:$0xf0]  ;;  %v2938_v54 = vld [vmem:[#allocation8 + $0x34] sm:$0xf] }
  0xb2   : > { %1470 = vmatpush.bf16.msrb.mxu3 %v2350_v60  ;;  %v2898_v60 = vld [vmem:[#allocation5 + $0x370] sm:$0xf0] }
  0xb3   : > { %1432 = vmatpush.bf16.msrb.mxu0 %v2050_v62  ;;  %v2922_v62 = vld [vmem:[#allocation5 + $0x430] sm:$0xf0] }
  0xb4   : > { %1445 = vmatpush.bf16.msrb.mxu1 %v2146_v3  ;;  %v2919_v3 = vld [vmem:[#allocation5 + $0x418] sm:$0xf0] }
  0xb5   : > { %1458 = vmatpush.bf16.msrb.mxu2 %v2242_v8  ;;  %v2625_v8 = vld [vmem:[#allocation8 + $0x40] sm:$0xf] }
  0xb6   : > { %1471 = vmatpush.bf16.msrb.mxu3 %v2338_v9  ;;  %v2542_v9 = vor.u32 %v2919_v3, %v2541_v2 }
  0xb7   : > { %1433 = vmatpush.bf16.msrb.mxu0 %v2038_v11  ;;  %v2529_v11 = vld [vmem:[#allocation5 + $0x3f8] sm:$0xf] }
  0xb8   : > { %1446 = vmatpush.bf16.msrb.mxu1 %v2134_v16  ;;  %v2530_v16 = vor.u32 %v2916_v13, %v2529_v11 }
  0xb9   : > { %1459 = vmatpush.bf16.msrb.mxu2 %v2230_v26  ;;  %v2409_v26 = vld [vmem:[#allocation5 + $0x308] sm:$0xf] }
  0xba   : > { %1472 = vmatpush.bf16.msrb.mxu3 %v2326_v27  ;;  %v2518_v27 = vor.u32 %v2913_v21, %v2517_v20  ;;  %v2958_v20 = vld [vmem:[#allocation8 + $0xd4] sm:$0xf]  ;;  %v2699_v21 = vld [vmem:[#allocation8 + $0xd8] sm:$0xf0] }
  0xbb   : > { %1434 = vmatpush.bf16.msrb.mxu0 %v2026_v29  ;;  %v2886_v29 = vld [vmem:[#allocation5 + $0x310] sm:$0xf0] }
  0xbc   : > { %1447 = vmatpush.bf16.msrb.mxu1 %v2122_v32  ;;  %v2505_v32 = vld [vmem:[#allocation5 + $0x3c8] sm:$0xf]  ;;  %v2410_v38 = vor.u32 %v2886_v29, %v2409_v26  ;;  %v2689_v29 = vld [vmem:[#allocation8 + $0xc0] sm:$0xf] }
  0xbd   : > { %1460 = vmatpush.bf16.msrb.mxu2 %v2218_v42  ;;  %v2643_v42 = vld [vmem:[#allocation8 + $0x68] sm:$0xf0] }
  0xbe   : > { %1435 = vmatmul.bf16.vlgmr.msrb.gmra.mxu0 %v3424_v57  ;;  %1473 = vmatpush.bf16.msrb.mxu3 %v2314_v43  ;;  %v2458_v57 = vor.u32 %v2898_v60, %v2457_v59  ;;  %v2646_v43 = vor.u32 %v2944_v41, %v2643_v42  ;;  %v2954_v41 = vld [vmem:[#allocation8 + $0xb4] sm:$0xf]  ;;  %v2683_v42 = vld [vmem:[#allocation8 + $0xb8] sm:$0xf0] }
  0xbf   : > { %1479 = vmatpush.bf16.msra.mxu0 %v2494_v34  ;;  %1448 = vmatmul.bf16.vlgmr.msrb.gmra.mxu1 %v3428_v1  ;;  %v2554_v1 = vor.u32 %v2922_v62, %v2553_v61  ;;  %v2910_v34 = vld [vmem:[#allocation5 + $0x3d0] sm:$0xf0]  ;;  %v2611_v61 = vld [vmem:[#allocation8 + $0x28] sm:$0xf0]  ;;  %v3459_v62 = vld [vmem:[#allocation7] sm:$0x7] }
  0xc0   : > { %1492 = vmatpush.bf16.msra.mxu1 %v2590_v37  ;;  %1461 = vmatmul.bf16.vlgmr.msrb.gmra.mxu2 %v3432_v12  ;;  %v2941_v12 = vld [vmem:[#allocation8 + $0x44] sm:$0xf0]  ;;  %v2651_v37 = vld [vmem:[#allocation8 + $0x78] sm:$0xf0]  ;;  %v2506_v39 = vor.u32 %v2910_v34, %v2505_v32  ;;  %v497_v11 = vperm.slane %v3459_v62, 0 }
  0xc1   : > { %1805 = vmatpush.bf16.msra.mxu2 %v2650_v50  ;;  %1474 = vmatmul.bf16.vlgmr.msrb.gmra.mxu3 %v3435_v17  ;;  %v2892_v17 = vld [vmem:[#allocation5 + $0x340] sm:$0xf0]  ;;  %v2626_v14 = vor.u32 %v2941_v12, %v2625_v8  ;;  %v2654_v40 = vor.u32 %v2946_v36, %v2651_v37  ;;  %v2935_v50 = vld [vmem:[#allocation8 + $0x14] sm:$0xf0]  ;;  %v2603_v8 = vld [vmem:[#allocation8 + $0x18] sm:$0xf0]  ;;  %v2718_v12 = vor.u32 %v2962_v0, %v2715_v4 }
  0xc2   : > { %v2434_v15 = vor.u32 %v2892_v17, %v2433_v10  ;;  %v2602_v52 = vor.u32 %v2935_v50, %v2601_v49  ;;  %v2707_v10 = vld [vmem:[#allocation8 + $0xe8] sm:$0xf0]  ;;  %v2956_v32 = vld [vmem:[#allocation8 + $0xc4] sm:$0xf]  ;;  %v2673_v49 = vld [vmem:[#allocation8 + $0xa0] sm:$0xf] }
  0xc3   : > { %1480 = vmatpush.bf16.msra.mxu0 %v2482_v44  ;;  %v2942_v44 = vld [vmem:[#allocation8 + $0x54] sm:$0xf]  ;;  %v2691_v34 = vld [vmem:[#allocation8 + $0xc8] sm:$0xf0]  ;;  %v2953_v50 = vld [vmem:[#allocation8 + $0xa4] sm:$0xf0] }
  0xc4   : > { %1493 = vmatpush.bf16.msra.mxu1 %v2578_v48  ;;  %v2638_v46 = vor.u32 %v2942_v44, %v2635_v45  ;;  %v2627_v48 = vld [vmem:[#allocation8 + $0x48] sm:$0xf0]  ;;  %v2694_v37 = vor.u32 %v2956_v32, %v2691_v34  ;;  %v2949_v4 = vld [vmem:[#allocation8 + $0x84] sm:$0xf0] }
  0xc5   : > { %1806 = vmatpush.bf16.msra.mxu2 %v2642_v56  ;;  %v2630_v51 = vor.u32 %v2940_v47, %v2627_v48  ;;  %v2593_v56 = vld [vmem:[#allocation8] sm:$0xf] }
  0xc7   : > { %1481 = vmatpush.bf16.msra.mxu0 %v2470_v55  ;;  %v2619_v55 = vld [vmem:[#allocation8 + $0x38] sm:$0xf0] }
  0xc8   : > { %1494 = vmatpush.bf16.msra.mxu1 %v2566_v58  ;;  %v2933_v58 = vld [vmem:[#allocation8 + $0x4] sm:$0xf0]  ;;  %v2622_v59 = vor.u32 %v2938_v54, %v2619_v55  ;;  %v2674_v54 = vor.u32 %v2953_v50, %v2673_v49  ;;  %v2675_v55 = vld [vmem:[#allocation8 + $0xa8] sm:$0xf0] }
  0xc9   : > { %1807 = vmatpush.bf16.msra.mxu2 %v2634_v7  ;;  %v2594_v60 = vor.u32 %v2933_v58, %v2593_v56  ;;  %v2755_v49 = vld [vmem:[#allocation8 + $0x148] sm:$0xf0] }
  0xcb   : > { %1482 = vmatpush.bf16.msra.mxu0 %v2458_v57  ;;  %v2934_v57 = vld [vmem:[#allocation8 + $0x14] sm:$0xf] }
  0xcc   : > { %1495 = vmatpush.bf16.msra.mxu1 %v2554_v1  ;;  %v2713_v1 = vld [vmem:[#allocation8 + $0xf0] sm:$0xf]  ;;  %v2606_v19 = vor.u32 %v2934_v57, %v2603_v8  ;;  %v2667_v57 = vld [vmem:[#allocation8 + $0x98] sm:$0xf0]  ;;  %v2659_v8 = vld [vmem:[#allocation8 + $0x88] sm:$0xf0] }
  0xcd   : > { %1808 = vmatpush.bf16.msra.mxu2 %v2626_v14  ;;  %v2714_v3 = vor.u32 %v2963_v63, %v2713_v1  ;;  %v2697_v14 = vld [vmem:[#allocation8 + $0xd0] sm:$0xf] }
  0xcf   : > { %1483 = vmatpush.bf16.msra.mxu0 %v2446_v6  ;;  %v2961_v6 = vld [vmem:[#allocation8 + $0xe4] sm:$0xf0]  ;;  %1818 = vmatpush.bf16.msra.mxu3 %v2714_v3  ;;  %v2657_v3 = vld [vmem:[#allocation8 + $0x80] sm:$0xf] }
  0xd0   : > { %1496 = vmatpush.bf16.msra.mxu1 %v2542_v9  ;;  %v2960_v9 = vld [vmem:[#allocation8 + $0xe4] sm:$0xf]  ;;  %v2706_v17 = vor.u32 %v2961_v6, %v2705_v5 }
  0xd1   : > { %1809 = vmatpush.bf16.msra.mxu2 %v2618_v24  ;;  %v2710_v13 = vor.u32 %v2960_v9, %v2707_v10  ;;  %v2948_v5 = vld [vmem:[#allocation8 + $0x84] sm:$0xf] }
  0xd2   : > { %v2662_v9 = vor.u32 %v2948_v5, %v2659_v8  ;;  %v2966_v5 = vld [vmem:[#allocation8 + $0x114] sm:$0xf] }
  0xd3   : > { %1484 = vmatpush.bf16.msra.mxu0 %v2434_v15  ;;  %v2959_v15 = vld [vmem:[#allocation8 + $0xd4] sm:$0xf0]  ;;  %1819 = vmatpush.bf16.msra.mxu3 %v2706_v17  ;;  %v498_v17 = vperm.slane %v3459_v62, 1 }
  0xd4   : > { %1497 = vmatpush.bf16.msra.mxu1 %v2530_v16 }
  0xd5   : > { %1810 = vmatpush.bf16.msra.mxu2 %v2610_v35  ;;  %v2690_v35 = vor.u32 %v2957_v30, %v2689_v29  ;;  %v2771_v29 = vld [vmem:[#allocation8 + $0x168] sm:$0xf0] }
  0xd7   : > { %1485 = vmatpush.bf16.msra.mxu0 %v2422_v25  ;;  %v2698_v25 = vor.u32 %v2959_v15, %v2697_v14 }
  0xd8   : > { %1498 = vmatpush.bf16.msra.mxu1 %v2518_v27  ;;  %v2702_v27 = vor.u32 %v2958_v20, %v2699_v21  ;;  %v2979_v20 = vld [vmem:[#allocation8 + $0x174] sm:$0xf0]  ;;  %v2978_v21 = vld [vmem:[#allocation8 + $0x174] sm:$0xf] }
  0xd9   : > { %1811 = vmatpush.bf16.msra.mxu2 %v2602_v52  ;;  %1820 = vmatpush.bf16.msra.mxu3 %v2698_v25  ;;  %v2977_v25 = vld [vmem:[#allocation8 + $0x164] sm:$0xf0] }
  0xdb   : > { %1486 = vmatpush.bf16.msra.mxu0 %v2410_v38  ;;  %v1280_v53 = vpop.f32.mrf.mxu0  ;;  %v2681_v38 = vld [vmem:[#allocation8 + $0xb0] sm:$0xf] }
  0xdc   : > { %1499 = vmatpush.bf16.msra.mxu1 %v2506_v39  ;;  %v1281_v26 = vadd.f32 %v1280_v53, %v497_v11  ;;  %v2955_v39 = vld [vmem:[#allocation8 + $0xb4] sm:$0xf0] }
  0xdd   : > { %1812 = vmatpush.bf16.msra.mxu2 %v2594_v60  ;;  %1821 = vmatpush.bf16.msra.mxu3 %v2690_v35  ;;  %v2682_v44 = vor.u32 %v2955_v39, %v2681_v38  ;;  %v2950_v60 = vld [vmem:[#allocation8 + $0x94] sm:$0xf]  ;;  %v2761_v35 = vld [vmem:[#allocation8 + $0x150] sm:$0xf] }
  0xde   : > { %1487 = vmatmul.bf16.vlgmr.msra.gmra.mxu0 %v3441_v28  ;;  %v1293_v28 = vpop.f32.mrf.mxu1  ;;  %v2670_v1 = vor.u32 %v2950_v60, %v2667_v57  ;;  %v2969_v57 = vld [vmem:[#allocation8 + $0x124] sm:$0xf0] }
  0xdf   : > { %1500 = vmatmul.bf16.vlgmr.msra.gmra.mxu1 %v3443_v33  ;;  %v2936_v33 = vld [vmem:[#allocation8 + $0x24] sm:$0xf]  ;;  %v1294_v36 = vadd.f32 %v1293_v28, %v1281_v26  ;;  %v2665_v28 = vld [vmem:[#allocation8 + $0x90] sm:$0xf]  ;;  %v2782_v26 = vor.u32 %v2978_v21, %v2779_v23  ;;  %v499_v21 = vperm.slane %v3459_v62, 2 }
  0xe0   : > { %1844 = vmatpush.bf16.msrb.mxu1 %v2654_v40  ;;  %v2614_v2 = vor.u32 %v2936_v33, %v2611_v61 }
  0xe1   : > { %1857 = vmatpush.bf16.msrb.mxu2 %v2718_v12  ;;  %1822 = vmatpush.bf16.msra.mxu3 %v2682_v44 }
  0xe3   : > { %v1282_v7 = vpop.f32.mrf.mxu0  ;;  %v1306_v18 = vpop.f32.mrf.mxu2 }
  0xe4   : > { %1845 = vmatpush.bf16.msrb.mxu1 %v2646_v43  ;;  %v1319_v24 = vpop.f32.mrf.mxu3  ;;  %v1307_v45 = vadd.f32 %v1306_v18, %v1294_v36  ;;  %v2658_v7 = vor.u32 %v2949_v4, %v2657_v3  ;;  %v2975_v36 = vld [vmem:[#allocation8 + $0x154] sm:$0xf0]  ;;  %v2729_v3 = vld [vmem:[#allocation8 + $0x110] sm:$0xf] }
  0xe5   : > { %1858 = vmatpush.bf16.msrb.mxu2 %v2710_v13  ;;  %1823 = vmatpush.bf16.msra.mxu3 %v2674_v54  ;;  %v2967_v4 = vld [vmem:[#allocation8 + $0x114] sm:$0xf0] }
  0xe6   : > { %v1295_v16 = vpop.f32.mrf.mxu1  ;;  %v1320_v47 = vadd.f32 %v1319_v24, %v1307_v45  ;;  %v2769_v24 = vld [vmem:[#allocation8 + $0x160] sm:$0xf] }
  0xe8   : > { %1846 = vmatpush.bf16.msrb.mxu1 %v2638_v46  ;;  %v2686_v46 = vor.u32 %v2954_v41, %v2683_v42  ;;  %v2763_v41 = vld [vmem:[#allocation8 + $0x158] sm:$0xf0] }
  0xe9   : > { %1859 = vmatpush.bf16.msrb.mxu2 %v2702_v27  ;;  %v2976_v27 = vld [vmem:[#allocation8 + $0x164] sm:$0xf] }
  0xea   : > { %v2774_v32 = vor.u32 %v2976_v27, %v2771_v29 }
  0xeb   : > { %v1308_v40 = vpop.f32.mrf.mxu2 }
  0xec   : > { %1847 = vmatpush.bf16.msrb.mxu1 %v2630_v51  ;;  %v1321_v43 = vpop.f32.mrf.mxu3  ;;  %v2952_v51 = vld [vmem:[#allocation8 + $0xa4] sm:$0xf]  ;;  %v2762_v40 = vor.u32 %v2975_v36, %v2761_v35 }
  0xed   : > { %1860 = vmatpush.bf16.msrb.mxu2 %v2694_v37  ;;  %v2678_v56 = vor.u32 %v2952_v51, %v2675_v55  ;;  %v2974_v37 = vld [vmem:[#allocation8 + $0x154] sm:$0xf]  ;;  %v2971_v55 = vld [vmem:[#allocation8 + $0x134] sm:$0xf0] }
  0xee   : > { %v2766_v44 = vor.u32 %v2974_v37, %v2763_v41 }
  0xf0   : > { %1848 = vmatpush.bf16.msrb.mxu1 %v2622_v59  ;;  %v2951_v59 = vld [vmem:[#allocation8 + $0x94] sm:$0xf0] }
  0xf1   : > { %1861 = vmatpush.bf16.msrb.mxu2 %v2686_v46  ;;  %v2666_v61 = vor.u32 %v2951_v59, %v2665_v28  ;;  %v2753_v46 = vld [vmem:[#allocation8 + $0x140] sm:$0xf] }
  0xf3   : > { %1824 = vmatpush.bf16.msra.mxu3 %v2666_v61  ;;  %v2737_v61 = vld [vmem:[#allocation8 + $0x120] sm:$0xf] }
  0xf4   : > { %1849 = vmatpush.bf16.msrb.mxu1 %v2614_v2 }
  0xf5   : > { %1862 = vmatpush.bf16.msrb.mxu2 %v2678_v56  ;;  %v2970_v56 = vld [vmem:[#allocation8 + $0x134] sm:$0xf] }
  0xf7   : > { %1825 = vmatpush.bf16.msra.mxu3 %v2658_v7  ;;  %v2731_v7 = vld [vmem:[#allocation8 + $0x118] sm:$0xf0] }
  0xf8   : > { %1850 = vmatpush.bf16.msrb.mxu1 %v2606_v19  ;;  %v2777_v19 = vld [vmem:[#allocation8 + $0x170] sm:$0xf]  ;;  %v2734_v8 = vor.u32 %v2966_v5, %v2731_v7 }
  0xf9   : > { %1863 = vmatpush.bf16.msrb.mxu2 %v2670_v1  ;;  %v2778_v22 = vor.u32 %v2979_v20, %v2777_v19  ;;  %v2968_v1 = vld [vmem:[#allocation8 + $0x124] sm:$0xf] }
  0xfb   : > { %v1332_v48 = vpop.f32.mrf.mxu0  ;;  %1831 = vmatpush.bf16.msrb.mxu0 %v2778_v22  ;;  %1870 = vmatpush.bf16.msrb.mxu3 %v2782_v26 }
  0xfc   : > { %1851 = vmatpush.bf16.msrb.mxu1 %v2598_v31  ;;  %v1333_v52 = vadd.f32 %v1332_v48, %v1320_v47  ;;  %v1345_v53 = vpop.f32.mrf.mxu1  ;;  %v2770_v31 = vor.u32 %v2977_v25, %v2769_v24  ;;  %v2973_v47 = vld [vmem:[#allocation8 + $0x144] sm:$0xf0]  ;;  %v2972_v48 = vld [vmem:[#allocation8 + $0x144] sm:$0xf] }
  0xfd   : > { %1864 = vmatpush.bf16.msrb.mxu2 %v2662_v9  ;;  %v2754_v51 = vor.u32 %v2973_v47, %v2753_v46 }
  0xfe   : > { %v1346_v58 = vadd.f32 %v1345_v53, %v1333_v52  ;;  %v2758_v52 = vor.u32 %v2972_v48, %v2755_v49  ;;  %v2745_v53 = vld [vmem:[#allocation8 + $0x130] sm:$0xf] }
  0xff   : > { %1832 = vmatpush.bf16.msrb.mxu0 %v2770_v31  ;;  %1871 = vmatpush.bf16.msrb.mxu3 %v2774_v32  ;;  %v2746_v60 = vor.u32 %v2971_v55, %v2745_v53 }
 0x100   : > { %v1505_v33 = vmax.f32 %v1346_v58, 0.0  ;;  %v2747_v58 = vld [vmem:[#allocation8 + $0x138] sm:$0xf0] }
 0x102   : > { %v1508_v63 = vpack.c.bf16 %v1505_v33, %v1505_v33  ;;  %v2750_v33 = vor.u32 %v2970_v56, %v2747_v58 }
 0x103   : > { %v1358_v0 = vpop.f32.mrf.mxu2  ;;  %v1334_v2 = vpop.f32.mrf.mxu0  ;;  %1833 = vmatpush.bf16.msrb.mxu0 %v2762_v40  ;;  %1872 = vmatpush.bf16.msrb.mxu3 %v2766_v44 }
 0x104   : > { %1813 = vmatmul.bf16.vlgmr.msra.gmra.mxu2 %v1508_v63  ;;  %1852 = vmatmul.bf16.vlgmr.msrb.gmra.mxu1 %v1508_v63  ;;  %v1347_v6 = vpop.f32.mrf.mxu1  ;;  %v1371_v12 = vpop.f32.mrf.mxu3  ;;  %v1359_v13 = vadd.f32 %v1358_v0, %v498_v17  ;;  %v2739_v63 = vld [vmem:[#allocation8 + $0x128] sm:$0xf0]  ;;  %v2738_v0 = vor.u32 %v2969_v57, %v2737_v61  ;;  %v2965_v17 = vld [vmem:[#allocation8 + $0x104] sm:$0xf0] }
 0x105   : > { %v2742_v2 = vor.u32 %v2968_v1, %v2739_v63  ;;  %v2730_v6 = vor.u32 %v2967_v4, %v2729_v3 }
 0x106   : > { %v1372_v14 = vadd.f32 %v1371_v12, %v1359_v13 }
 0x107   : > { %1834 = vmatpush.bf16.msrb.mxu0 %v2754_v51  ;;  %1873 = vmatpush.bf16.msrb.mxu3 %v2758_v52 }
 0x10b   : > { %v1360_v10 = vpop.f32.mrf.mxu2  ;;  %1835 = vmatpush.bf16.msrb.mxu0 %v2746_v60  ;;  %1874 = vmatpush.bf16.msrb.mxu3 %v2750_v33 }
 0x10c   : > { %v1373_v11 = vpop.f32.mrf.mxu3  ;;  %v2721_v10 = vld [vmem:[#allocation8 + $0x100] sm:$0xf] }
 0x10d   : > { %v2964_v11 = vld [vmem:[#allocation8 + $0x104] sm:$0xf]  ;;  %v2722_v13 = vor.u32 %v2965_v17, %v2721_v10 }
 0x10f   : > { %1836 = vmatpush.bf16.msrb.mxu0 %v2738_v0  ;;  %1875 = vmatpush.bf16.msrb.mxu3 %v2742_v2 }
 0x113   : > { %1837 = vmatpush.bf16.msrb.mxu0 %v2730_v6  ;;  %1876 = vmatpush.bf16.msrb.mxu3 %v2734_v8 }
 0x117   : > { %1838 = vmatpush.bf16.msrb.mxu0 %v2722_v13 }
 0x11b   : > { %v1384_v15 = vpop.f32.mrf.mxu0 }
 0x11c   : > { %v1385_v16 = vadd.f32 %v1384_v15, %v1372_v14  ;;  %v1397_v18 = vpop.f32.mrf.mxu1  ;;  %v2723_v14 = vld [vmem:[#allocation8 + $0x108] sm:$0xf0] }
 0x11d   : > { %v2726_v15 = vor.u32 %v2964_v11, %v2723_v14 }
 0x11e   : > { %v1398_v30 = vadd.f32 %v1397_v18, %v1385_v16 }
 0x11f   : > { %1877 = vmatpush.bf16.msrb.mxu3 %v2726_v15 }
 0x123   : > { %v1410_v34 = vpop.f32.mrf.mxu2  ;;  %v1386_v39 = vpop.f32.mrf.mxu0 }
 0x124   : > { %v1411_v38 = vadd.f32 %v1410_v34, %v1398_v30  ;;  %v1423_v42 = vpop.f32.mrf.mxu3  ;;  %v1399_v43 = vpop.f32.mrf.mxu1 }
 0x126   : > { %v1424_v45 = vadd.f32 %v1423_v42, %v1411_v38 }
 0x128   : > { %v1506_v50 = vmax.f32 %v1424_v45, 0.0  ;;  %v1559_v45 = vld [vmem:[%s3505_s4] sm:$0x3] }
 0x129   : > { %v1561_v46 = vperm.slane %v1559_v45, 0  ;;  %v1562_v48 = vperm.slane %v1559_v45, 1 }
 0x12a   : > { %v1509_v54 = vpack.c.bf16 %v1506_v50, %v1506_v50 }
 0x12b   : > { %v1412_v28 = vpop.f32.mrf.mxu2 }
 0x12c   : > { %1826 = vmatmul.bf16.vlgmr.msra.gmra.mxu3 %v1509_v54  ;;  %1865 = vmatmul.bf16.vlgmr.msrb.gmra.mxu2 %v1509_v54  ;;  %v1425_v59 = vpop.f32.mrf.mxu3 }
 0x13b   : > { %v1436_v12 = vpop.f32.mrf.mxu0 }
 0x13c   : > { %v1449_v9 = vpop.f32.mrf.mxu1  ;;  %v1437_v22 = vadd.f32 %v1436_v12, %v499_v21 }
 0x13e   : > { %v1450_v25 = vadd.f32 %v1449_v9, %v1437_v22 }
 0x143   : > { %v1438_v16 = vpop.f32.mrf.mxu0  ;;  %v1462_v19 = vpop.f32.mrf.mxu2 }
 0x144   : > { %v1451_v18 = vpop.f32.mrf.mxu1  ;;  %v1475_v20 = vpop.f32.mrf.mxu3  ;;  %v1463_v26 = vadd.f32 %v1462_v19, %v1450_v25 }
 0x146   : > { %v1476_v27 = vadd.f32 %v1475_v20, %v1463_v26 }
 0x14b   : > { %v1464_v23 = vpop.f32.mrf.mxu2 }
 0x14c   : > { %v1477_v24 = vpop.f32.mrf.mxu3 }
 0x15b   : > { %v1488_v29 = vpop.f32.mrf.mxu0 }
 0x15c   : > { %v1489_v30 = vadd.f32 %v1488_v29, %v1476_v27  ;;  %v1501_v31 = vpop.f32.mrf.mxu1 }
 0x15e   : > { %v1502_v32 = vadd.f32 %v1501_v31, %v1489_v30 }
 0x160   : > { %v1507_v34 = vmax.f32 %v1502_v32, 0.0 }
 0x162   : > { %v1510_v35 = vpack.c.bf16 %v1507_v34, %v1507_v34 }
 0x163   : > { %v1490_v36 = vpop.f32.mrf.mxu0 }
 0x164   : > { %v1503_v37 = vpop.f32.mrf.mxu1  ;;  %1839 = vmatmul.bf16.vlgmr.msrb.gmra.mxu0 %v1510_v35  ;;  %1878 = vmatmul.bf16.vlgmr.msrb.gmra.mxu3 %v1510_v35 }
 0x181   : > { %v1853_v38 = vpop.f32.mrf.mxu1 }
 0x182   : > { %v1854_v52 = vadd.f32 %v1853_v38, %v1562_v48 }
 0x187   : > { %v1814_v62 = vpop.f32.mrf.mxu2 }
 0x188   : > { %v1815_v47 = vadd.f32 %v1814_v62, %v1561_v46 }
 0x189   : > { %v1855_v39 = vpop.f32.mrf.mxu1 }
 0x18f   : > { %v1816_v40 = vpop.f32.mrf.mxu2 }
 0x1af   : > { %v1827_v41 = vpop.f32.mrf.mxu3  ;;  %v1866_v42 = vpop.f32.mrf.mxu2 }
 0x1b0   : > { %v1828_v49 = vadd.f32 %v1827_v41, %v1815_v47  ;;  %v1867_v54 = vadd.f32 %v1866_v42, %v1854_v52 }
 0x1b7   : > { %v1829_v43 = vpop.f32.mrf.mxu3  ;;  %v1868_v44 = vpop.f32.mrf.mxu2 }
 0x1e1   : > { %v1840_v50 = vpop.f32.mrf.mxu0 }
 0x1e2   : > { %v1841_v51 = vadd.f32 %v1840_v50, %v1828_v49 }
 0x1e4   : > { %v1883_v53 = vmax.f32 %v1841_v51, 0.0 }
 0x1e6   : > { %1885 = vst [vmem:[%s290_s17] sm:$0xff] %v1883_v53 }
 0x1e7   : > { %v1879_v55 = vpop.f32.mrf.mxu3 }
 0x1e8   : > { %v1880_v56 = vadd.f32 %v1879_v55, %v1867_v54 }
 0x1e9   : > { %v1842_v58 = vpop.f32.mrf.mxu0 }
 0x1ea   : > { %v1884_v28 = vmax.f32 %v1880_v56, 0.0 }
 0x1ec   : > { %1886 = vst [vmem:[%s290_s17 + $0x8] sm:$0xff] %v1884_v28 }
 0x1ed   : > { %3212 = shalt.err (!%p3209_p9)
}
 0x1ee   : > { %2998 = dma.vmem_to_hbm [thread:$0]  (%p3374_p0), %s1902_s22, 256, %s1904_s23, %s1888_s25  }
 0x1ef   : > { %v1881_v59 = vpop.f32.mrf.mxu3 }
 0x1f0 PF: > { %s1915_s7 = sand.u32 1, %s3247_s18   ;;  %p3517_p10 = scmp.ge.s32.totalorder %s3259_s21, 2 }
 0x1f1   : > { %s1916_s2 = scalar_lea.sflag [#allocation4], %s1915_s7 }
 0x1f2   : > { %p3015_p11 = pnand %p3517_p10, %p3380_p6 }
 0x1f4   : > { %p3016_p12 = pneg %p3015_p11 }
 0x1f6   : > { %3242 = dma.done.wait (%p3016_p12), %s1916_s2, 256  }
 0x1f7   : > { %3244 = vsyncadd (%p3016_p12), %s1916_s2, 4294967040  ;;  %p20_p2 = scmp.ge.s32.totalorder %s3354_s24, 4   ;;  %s3518_s18 = smov %s3251_s19 }
 0x1f8   : > { %s3519_s19 = smov %s3255_s20  ;;  %s3520_s20 = smov %s3366_s29 }
 0x1f9   : > { %s3521_s21 = smov %s3354_s24  ;;  %22 = sbr.rel (!%p20_p2) target bundleno = 10 (0xa), region = 97 }
 0x1fe   :  { %1922 = vsyncpa [#allocation3], 1 }
 0x1ff   :  { %1924 = vsyncpa [#allocation3 + $0x1], 1 }
 0x200   :  { %1925 = vsyncpa [#allocation6], 1 }
 0x201   :  { %1926 = vsyncpa [#allocation9], 1 }
 0x202   :  { %1927 = vsyncpa [#allocation4], 1 }
 0x203   :  { %1929 = vsyncpa [#allocation4 + $0x1], 1 }

</bundles_post_ra>
